<compile_context>
chip_gen: v5e
topology: v5e:2x2
jax: 0.10.0
libtpu: 0.0.40
codegen_flags: <defaults>
</compile_context>

<pallas_src>
import jax
import jax.numpy as jnp
from jax.experimental import pallas as pl
from jax.experimental.pallas import tpu as pltpu

MXU_DTYPE = jnp.bfloat16   # MXU operand dtype (accumulation stays f32). Use jnp.float32 for exact f32.
_TQ_MAX = 512              # row tile for the conv GEMM grid (VMEM-safe on v7x, amortizes grid overhead)
_CPAD = 128                # output-channel padding -> lane-dense (unmasked) stores


def _round_up(x, m):
    return (x + m - 1) // m * m


def _kpad(cin, k):
    # contraction-dim padding: at least 32, multiple of 8
    return _round_up(max(cin * k * k, 32), 8)


# ---------------------------------------------------------------------------
# Pallas kernels
# ---------------------------------------------------------------------------
def _conv_pool_relu_kernel(p_ref, w_ref, b_ref, o_ref):
    """relu(max_pool2x2(conv(x) + b)) for one row tile.

    p_ref: (4, TQ, Kpad) patches, leading axis = 2x2 pool tap (di, dj)
    w_ref: (Kpad, 128)   b_ref: (1, 128)   o_ref: (TQ, 128)
    """
    acc = jnp.dot(p_ref[0], w_ref[...], preferred_element_type=jnp.float32)
    for d in range(1, 4):
        acc = jnp.maximum(
            acc, jnp.dot(p_ref[d], w_ref[...], preferred_element_type=jnp.float32))
    # max_pool(conv + b) == max_pool(conv) + b, then ReLU (f32 epilogue)
    o_ref[...] = jnp.maximum(acc + b_ref[...], 0.0)


def _fc_head_kernel(x_ref, w1_ref, b1_ref, w2_ref, b2_ref, o_ref):
    """Fused fc1 + ReLU + fc2 + log_softmax (dropout is identity in eval)."""
    h = jnp.dot(x_ref[...], w1_ref[...], preferred_element_type=jnp.float32) + b1_ref[...]
    h = jnp.maximum(h, 0.0)
    logits = jnp.dot(h.astype(w2_ref.dtype), w2_ref[...],
                     preferred_element_type=jnp.float32) + b2_ref[...]
    # padded logit lanes carry -1e9 -> exp() == 0, so the 128-lane reduction
    # equals log_softmax over the 10 real classes (all in f32).
    m = jnp.max(logits, axis=-1, keepdims=True)
    shifted = logits - m
    lse = jnp.log(jnp.sum(jnp.exp(shifted), axis=-1, keepdims=True))
    o_ref[...] = shifted - lse


# ---------------------------------------------------------------------------
# Glue: pooled-patch extraction + conv/fc drivers
# ---------------------------------------------------------------------------
def _extract_pooled_patches(xh, k, mxu_dtype):
    """xh: (N, H, W, Cin) NHWC activation.

    Returns ((4, Q, Kpad) patches, Ph, Pw) for a valid k x k conv followed by a
    2x2/stride-2 max-pool. Leading axis = pool tap d = 2*di + dj, rows ordered
    (n, pi, pj), columns ordered (ci, ki, kj) (PyTorch weight flattening order),
    zero-padded to Kpad and cast to the MXU dtype.
    """
    n, h, w, cin = xh.shape
    ph, pw = (h - k + 1) // 2, (w - k + 1) // 2
    kdim = cin * k * k
    kpad = _kpad(cin, k)
    taps = []
    for di in range(2):
        for dj in range(2):
            wins = [
                xh[:, di + ki: di + ki + 2 * ph: 2, dj + kj: dj + kj + 2 * pw: 2, :]
                for ki in range(k) for kj in range(k)
            ]                                            # each (N, Ph, Pw, Cin)
            blk = jnp.stack(wins, axis=-1)               # (N, Ph, Pw, Cin, k*k)
            taps.append(blk.reshape(n * ph * pw, kdim))  # col = ci*k*k + ki*k + kj
    patches = jnp.stack(taps, axis=0)                    # (4, Q, Kdim)
    if kpad != kdim:
        patches = jnp.pad(patches, ((0, 0), (0, 0), (0, kpad - kdim)))
    return patches.astype(mxu_dtype), ph, pw


def _conv_pool_relu(xh, w_mat, b_row, k):
    """Valid conv (stride 1) + 2x2 max-pool + ReLU, fused in one Pallas kernel.

    xh: (N, H, W, Cin) f32; w_mat: (Kpad, 128); b_row: (1, 128).
    Returns (N, Ph, Pw, 128) f32 (channels zero-padded to 128 lanes).
    """
    n = xh.shape[0]
    patches, ph, pw = _extract_pooled_patches(xh, k, w_mat.dtype)
    q = n * ph * pw
    kpad = patches.shape[-1]
    assert kpad == w_mat.shape[0], (kpad, w_mat.shape)

    tq = _TQ_MAX if q > _TQ_MAX else _round_up(q, 8)
    qpad = _round_up(q, tq)
    if qpad != q:
        patches = jnp.pad(patches, ((0, 0), (0, qpad - q), (0, 0)))

    out = pl.pallas_call(
        _conv_pool_relu_kernel,
        out_shape=jax.ShapeDtypeStruct((qpad, _CPAD), jnp.float32),
        grid_spec=pltpu.PrefetchScalarGridSpec(
            num_scalar_prefetch=0,
            grid=(qpad // tq,),
            in_specs=[
                pl.BlockSpec((4, tq, kpad), lambda i: (0, i, 0)),
                pl.BlockSpec((kpad, _CPAD), lambda i: (0, 0)),
                pl.BlockSpec((1, _CPAD), lambda i: (0, 0)),
            ],
            out_specs=pl.BlockSpec((tq, _CPAD), lambda i: (i, 0)),
        ),
        compiler_params=pltpu.CompilerParams(
            dimension_semantics=("parallel",)),   # megacore split on v7x
    )(patches, w_mat, b_row)
    return out[:q].reshape(n, ph, pw, _CPAD)


def _fc_head(flat, w1, b1, w2, b2):
    n = flat.shape[0]
    return pl.pallas_call(
        _fc_head_kernel,
        out_shape=jax.ShapeDtypeStruct((n, _CPAD), jnp.float32),
        in_specs=[pl.BlockSpec(memory_space=pltpu.MemorySpace.VMEM)] * 5,
        out_specs=pl.BlockSpec(memory_space=pltpu.MemorySpace.VMEM),
    )(flat.astype(w1.dtype), w1, b1, w2, b2)


# ---------------------------------------------------------------------------
# Parameter prep (one-time) and forward pass
# ---------------------------------------------------------------------------
def prepare_params(params, mxu_dtype=MXU_DTYPE):
    """Hoist all reshapes/transposes/padding out of the per-call path."""
    def conv_mat(wgt, bias):
        cout, cin, k, _ = wgt.shape
        kdim, kpad = cin * k * k, _kpad(cin, k)
        m = jnp.zeros((kpad, _CPAD), jnp.float32).at[:kdim, :cout].set(
            wgt.reshape(cout, kdim).T)
        b = jnp.zeros((1, _CPAD), jnp.float32).at[0, :cout].set(bias)
        return m.astype(mxu_dtype), b

    w1m, b1r = conv_mat(params["conv1_w"], params["conv1_b"])
    w2m, b2r = conv_mat(params["conv2_w"], params["conv2_b"])

    f1 = jnp.zeros((320, 64), jnp.float32).at[:, :50].set(params["fc1_w"].T)
    f1b = jnp.zeros((1, 64), jnp.float32).at[0, :50].set(params["fc1_b"])
    f2 = jnp.zeros((64, _CPAD), jnp.float32).at[:50, :10].set(params["fc2_w"].T)
    f2b = jnp.full((1, _CPAD), -1e9, jnp.float32).at[0, :10].set(params["fc2_b"])
    return {
        "conv1_w": w1m, "conv1_b": b1r,
        "conv2_w": w2m, "conv2_b": b2r,
        "fc1_w": f1.astype(mxu_dtype), "fc1_b": f1b,
        "fc2_w": f2.astype(mxu_dtype), "fc2_b": f2b,
    }


def mynet_forward(prepped, x):
    """Eval-mode forward of MyNet. x: (N, 1, 28, 28) f32 NCHW -> (N, 10) log-probs."""
    n = x.shape[0]
    xh = jnp.transpose(x, (0, 2, 3, 1))                                   # NHWC
    # conv1 -> maxpool(2) -> relu (bias+pool+relu fused in the GEMM epilogue)
    a1 = _conv_pool_relu(xh, prepped["conv1_w"], prepped["conv1_b"], k=5)[..., :10]
    # conv2 -> Dropout2d (identity, eval) -> maxpool(2) -> relu
    a2 = _conv_pool_relu(a1, prepped["conv2_w"], prepped["conv2_b"], k=5)[..., :20]
    # x.view(-1, 320): PyTorch flattens the NCHW tensor in (C, H, W) order
    flat = jnp.transpose(a2, (0, 3, 1, 2)).reshape(n, 320)
    # fc1+relu -> dropout (identity, eval) -> fc2 -> log_softmax, one kernel
    out = _fc_head(flat, prepped["fc1_w"], prepped["fc1_b"],
                   prepped["fc2_w"], prepped["fc2_b"])
    return out[:, :10]


def init_params(key):
    ks = jax.random.split(key, 8)
    s = 0.1
    return {
        "conv1_w": s * jax.random.normal(ks[0], (10, 1, 5, 5), jnp.float32),
        "conv1_b": s * jax.random.normal(ks[1], (10,), jnp.float32),
        "conv2_w": s * jax.random.normal(ks[2], (20, 10, 5, 5), jnp.float32),
        "conv2_b": s * jax.random.normal(ks[3], (20,), jnp.float32),
        "fc1_w": s * jax.random.normal(ks[4], (50, 320), jnp.float32),   # PyTorch (out, in)
        "fc1_b": s * jax.random.normal(ks[5], (50,), jnp.float32),
        "fc2_w": s * jax.random.normal(ks[6], (10, 50), jnp.float32),
        "fc2_b": s * jax.random.normal(ks[7], (10,), jnp.float32),
    }


if __name__ == "__main__":
    key = jax.random.PRNGKey(0)
    pkey, xkey = jax.random.split(key)
    params = init_params(pkey)
    prepped = prepare_params(params)           # one-time weight layout prep
    # Input must be 28x28 so the flattened feature size is 20*4*4 = 320.
    x = jax.random.normal(xkey, (2, 1, 28, 28), jnp.float32)

    fwd = jax.jit(mynet_forward)
    out = jax.block_until_ready(fwd(prepped, x))

    assert out.shape == (2, 10), out.shape
    assert bool(jnp.all(jnp.isfinite(out)))
    # log_softmax rows must exponentiate-sum to 1
    assert bool(jnp.allclose(jnp.sum(jnp.exp(out), axis=1), 1.0, atol=1e-4))
    print("KERNEL_OK")
</pallas_src>

<mosaic_0001>
module attributes {stable_mosaic.version = 11 : i64} {
  func.func @_conv_pool_relu_kernel(%arg0: i32, %arg1: memref<4x288x32xbf16, #tpu.memory_space<vmem>>, %arg2: memref<32x128xbf16, #tpu.memory_space<vmem>>, %arg3: memref<1x128xf32, #tpu.memory_space<vmem>>, %arg4: memref<288x128xf32, #tpu.memory_space<vmem>>) attributes {dimension_semantics = [#tpu.dimension_semantics<parallel>], iteration_bounds = array<i64: 1>, scalar_prefetch = 0 : i64, scratch_operands = 0 : i64, tpu.core_type = #tpu.core_type<tc>, window_params = [{transform_indices = @transform_0, window_bounds = array<i64: 4, 288, 32>}, {pipeline_mode = #tpu.pipeline_mode<synchronous>, transform_indices = @transform_1, window_bounds = array<i64: 32, 128>}, {pipeline_mode = #tpu.pipeline_mode<synchronous>, transform_indices = @transform_2, window_bounds = array<i64: 1, 128>}, {transform_indices = @transform_3, window_bounds = array<i64: 288, 128>}]} {
    %c0 = arith.constant 0 : index
    %c0_0 = arith.constant 0 : index
    %c0_1 = arith.constant 0 : index
    %0 = vector.load %arg1[%c0, %c0_0, %c0_1] : memref<4x288x32xbf16, #tpu.memory_space<vmem>>, vector<1x288x32xbf16>
    %1 = vector.shape_cast %0 : vector<1x288x32xbf16> to vector<288x32xbf16>
    %c0_2 = arith.constant 0 : index
    %c0_3 = arith.constant 0 : index
    %2 = vector.load %arg2[%c0_2, %c0_3] : memref<32x128xbf16, #tpu.memory_space<vmem>>, vector<32x128xbf16>
    %cst = arith.constant dense<0.000000e+00> : vector<288x128xf32>
    %3 = tpu.matmul %1, %2, %cst {dimension_numbers = #tpu.dot_dimension_numbers<[1], [0], [0], [1], [0, 0, 1, 1], [], []>} : vector<288x32xbf16>, vector<32x128xbf16>, vector<288x128xf32> -> vector<288x128xf32>
    %c1 = arith.constant 1 : index
    %c0_4 = arith.constant 0 : index
    %c0_5 = arith.constant 0 : index
    %4 = vector.load %arg1[%c1, %c0_4, %c0_5] : memref<4x288x32xbf16, #tpu.memory_space<vmem>>, vector<1x288x32xbf16>
    %5 = vector.shape_cast %4 : vector<1x288x32xbf16> to vector<288x32xbf16>
    %c0_6 = arith.constant 0 : index
    %c0_7 = arith.constant 0 : index
    %6 = vector.load %arg2[%c0_6, %c0_7] : memref<32x128xbf16, #tpu.memory_space<vmem>>, vector<32x128xbf16>
    %cst_8 = arith.constant dense<0.000000e+00> : vector<288x128xf32>
    %7 = tpu.matmul %5, %6, %cst_8 {dimension_numbers = #tpu.dot_dimension_numbers<[1], [0], [0], [1], [0, 0, 1, 1], [], []>} : vector<288x32xbf16>, vector<32x128xbf16>, vector<288x128xf32> -> vector<288x128xf32>
    %8 = arith.maximumf %3, %7 : vector<288x128xf32>
    %c2 = arith.constant 2 : index
    %c0_9 = arith.constant 0 : index
    %c0_10 = arith.constant 0 : index
    %9 = vector.load %arg1[%c2, %c0_9, %c0_10] : memref<4x288x32xbf16, #tpu.memory_space<vmem>>, vector<1x288x32xbf16>
    %10 = vector.shape_cast %9 : vector<1x288x32xbf16> to vector<288x32xbf16>
    %c0_11 = arith.constant 0 : index
    %c0_12 = arith.constant 0 : index
    %11 = vector.load %arg2[%c0_11, %c0_12] : memref<32x128xbf16, #tpu.memory_space<vmem>>, vector<32x128xbf16>
    %cst_13 = arith.constant dense<0.000000e+00> : vector<288x128xf32>
    %12 = tpu.matmul %10, %11, %cst_13 {dimension_numbers = #tpu.dot_dimension_numbers<[1], [0], [0], [1], [0, 0, 1, 1], [], []>} : vector<288x32xbf16>, vector<32x128xbf16>, vector<288x128xf32> -> vector<288x128xf32>
    %13 = arith.maximumf %8, %12 : vector<288x128xf32>
    %c3 = arith.constant 3 : index
    %c0_14 = arith.constant 0 : index
    %c0_15 = arith.constant 0 : index
    %14 = vector.load %arg1[%c3, %c0_14, %c0_15] : memref<4x288x32xbf16, #tpu.memory_space<vmem>>, vector<1x288x32xbf16>
    %15 = vector.shape_cast %14 : vector<1x288x32xbf16> to vector<288x32xbf16>
    %c0_16 = arith.constant 0 : index
    %c0_17 = arith.constant 0 : index
    %16 = vector.load %arg2[%c0_16, %c0_17] : memref<32x128xbf16, #tpu.memory_space<vmem>>, vector<32x128xbf16>
    %cst_18 = arith.constant dense<0.000000e+00> : vector<288x128xf32>
    %17 = tpu.matmul %15, %16, %cst_18 {dimension_numbers = #tpu.dot_dimension_numbers<[1], [0], [0], [1], [0, 0, 1, 1], [], []>} : vector<288x32xbf16>, vector<32x128xbf16>, vector<288x128xf32> -> vector<288x128xf32>
    %18 = arith.maximumf %13, %17 : vector<288x128xf32>
    %c0_19 = arith.constant 0 : index
    %c0_20 = arith.constant 0 : index
    %19 = vector.load %arg3[%c0_19, %c0_20] : memref<1x128xf32, #tpu.memory_space<vmem>>, vector<1x128xf32>
    %20 = vector.broadcast %19 : vector<1x128xf32> to vector<288x128xf32>
    %21 = arith.addf %18, %20 : vector<288x128xf32>
    %cst_21 = arith.constant 0.000000e+00 : f32
    %22 = vector.broadcast %cst_21 : f32 to vector<288x128xf32>
    %23 = arith.maximumf %21, %22 : vector<288x128xf32>
    %c0_22 = arith.constant 0 : index
    %c0_23 = arith.constant 0 : index
    %24 = vector.load %arg4[%c0_22, %c0_23] : memref<288x128xf32, #tpu.memory_space<vmem>>, vector<288x128xf32>
    tpu.vector_store %arg4[%c0_22, %c0_23], %23 {strides = array<i32>} : memref<288x128xf32, #tpu.memory_space<vmem>>, vector<288x128xf32>,
    return
  }
  func.func @transform_0(%arg0: i32) -> (i32, i32, i32) {
    %c0_i32 = arith.constant 0 : i32
    %c0_i32_0 = arith.constant 0 : i32
    %c0_i32_1 = arith.constant 0 : i32
    return %c0_i32, %arg0, %c0_i32_0 : i32, i32, i32
  }
  func.func @transform_1(%arg0: i32) -> (i32, i32) {
    %c0_i32 = arith.constant 0 : i32
    %c0_i32_0 = arith.constant 0 : i32
    %c0_i32_1 = arith.constant 0 : i32
    return %c0_i32, %c0_i32_0 : i32, i32
  }
  func.func @transform_2(%arg0: i32) -> (i32, i32) {
    %c0_i32 = arith.constant 0 : i32
    %c0_i32_0 = arith.constant 0 : i32
    %c0_i32_1 = arith.constant 0 : i32
    return %c0_i32, %c0_i32_0 : i32, i32
  }
  func.func @transform_3(%arg0: i32) -> (i32, i32) {
    %c0_i32 = arith.constant 0 : i32
    %c0_i32_0 = arith.constant 0 : i32
    return %arg0, %c0_i32 : i32, i32
  }
}

module attributes {stable_mosaic.version = 11 : i64} {
  func.func @_conv_pool_relu_kernel(%arg0: i32, %arg1: memref<4x32x256xbf16, #tpu.memory_space<vmem>>, %arg2: memref<256x128xbf16, #tpu.memory_space<vmem>>, %arg3: memref<1x128xf32, #tpu.memory_space<vmem>>, %arg4: memref<32x128xf32, #tpu.memory_space<vmem>>) attributes {dimension_semantics = [#tpu.dimension_semantics<parallel>], iteration_bounds = array<i64: 1>, scalar_prefetch = 0 : i64, scratch_operands = 0 : i64, tpu.core_type = #tpu.core_type<tc>, window_params = [{transform_indices = @transform_0, window_bounds = array<i64: 4, 32, 256>}, {pipeline_mode = #tpu.pipeline_mode<synchronous>, transform_indices = @transform_1, window_bounds = array<i64: 256, 128>}, {pipeline_mode = #tpu.pipeline_mode<synchronous>, transform_indices = @transform_2, window_bounds = array<i64: 1, 128>}, {transform_indices = @transform_3, window_bounds = array<i64: 32, 128>}]} {
    %c0 = arith.constant 0 : index
    %c0_0 = arith.constant 0 : index
    %c0_1 = arith.constant 0 : index
    %0 = vector.load %arg1[%c0, %c0_0, %c0_1] : memref<4x32x256xbf16, #tpu.memory_space<vmem>>, vector<1x32x256xbf16>
    %1 = vector.shape_cast %0 : vector<1x32x256xbf16> to vector<32x256xbf16>
    %c0_2 = arith.constant 0 : index
    %c0_3 = arith.constant 0 : index
    %2 = vector.load %arg2[%c0_2, %c0_3] : memref<256x128xbf16, #tpu.memory_space<vmem>>, vector<256x128xbf16>
    %cst = arith.constant dense<0.000000e+00> : vector<32x128xf32>
    %3 = tpu.matmul %1, %2, %cst {dimension_numbers = #tpu.dot_dimension_numbers<[1], [0], [0], [1], [0, 0, 1, 1], [], []>} : vector<32x256xbf16>, vector<256x128xbf16>, vector<32x128xf32> -> vector<32x128xf32>
    %c1 = arith.constant 1 : index
    %c0_4 = arith.constant 0 : index
    %c0_5 = arith.constant 0 : index
    %4 = vector.load %arg1[%c1, %c0_4, %c0_5] : memref<4x32x256xbf16, #tpu.memory_space<vmem>>, vector<1x32x256xbf16>
    %5 = vector.shape_cast %4 : vector<1x32x256xbf16> to vector<32x256xbf16>
    %c0_6 = arith.constant 0 : index
    %c0_7 = arith.constant 0 : index
    %6 = vector.load %arg2[%c0_6, %c0_7] : memref<256x128xbf16, #tpu.memory_space<vmem>>, vector<256x128xbf16>
    %cst_8 = arith.constant dense<0.000000e+00> : vector<32x128xf32>
    %7 = tpu.matmul %5, %6, %cst_8 {dimension_numbers = #tpu.dot_dimension_numbers<[1], [0], [0], [1], [0, 0, 1, 1], [], []>} : vector<32x256xbf16>, vector<256x128xbf16>, vector<32x128xf32> -> vector<32x128xf32>
    %8 = arith.maximumf %3, %7 : vector<32x128xf32>
    %c2 = arith.constant 2 : index
    %c0_9 = arith.constant 0 : index
    %c0_10 = arith.constant 0 : index
    %9 = vector.load %arg1[%c2, %c0_9, %c0_10] : memref<4x32x256xbf16, #tpu.memory_space<vmem>>, vector<1x32x256xbf16>
    %10 = vector.shape_cast %9 : vector<1x32x256xbf16> to vector<32x256xbf16>
    %c0_11 = arith.constant 0 : index
    %c0_12 = arith.constant 0 : index
    %11 = vector.load %arg2[%c0_11, %c0_12] : memref<256x128xbf16, #tpu.memory_space<vmem>>, vector<256x128xbf16>
    %cst_13 = arith.constant dense<0.000000e+00> : vector<32x128xf32>
    %12 = tpu.matmul %10, %11, %cst_13 {dimension_numbers = #tpu.dot_dimension_numbers<[1], [0], [0], [1], [0, 0, 1, 1], [], []>} : vector<32x256xbf16>, vector<256x128xbf16>, vector<32x128xf32> -> vector<32x128xf32>
    %13 = arith.maximumf %8, %12 : vector<32x128xf32>
    %c3 = arith.constant 3 : index
    %c0_14 = arith.constant 0 : index
    %c0_15 = arith.constant 0 : index
    %14 = vector.load %arg1[%c3, %c0_14, %c0_15] : memref<4x32x256xbf16, #tpu.memory_space<vmem>>, vector<1x32x256xbf16>
    %15 = vector.shape_cast %14 : vector<1x32x256xbf16> to vector<32x256xbf16>
    %c0_16 = arith.constant 0 : index
    %c0_17 = arith.constant 0 : index
    %16 = vector.load %arg2[%c0_16, %c0_17] : memref<256x128xbf16, #tpu.memory_space<vmem>>, vector<256x128xbf16>
    %cst_18 = arith.constant dense<0.000000e+00> : vector<32x128xf32>
    %17 = tpu.matmul %15, %16, %cst_18 {dimension_numbers = #tpu.dot_dimension_numbers<[1], [0], [0], [1], [0, 0, 1, 1], [], []>} : vector<32x256xbf16>, vector<256x128xbf16>, vector<32x128xf32> -> vector<32x128xf32>
    %18 = arith.maximumf %13, %17 : vector<32x128xf32>
    %c0_19 = arith.constant 0 : index
    %c0_20 = arith.constant 0 : index
    %19 = vector.load %arg3[%c0_19, %c0_20] : memref<1x128xf32, #tpu.memory_space<vmem>>, vector<1x128xf32>
    %20 = vector.broadcast %19 : vector<1x128xf32> to vector<32x128xf32>
    %21 = arith.addf %18, %20 : vector<32x128xf32>
    %cst_21 = arith.constant 0.000000e+00 : f32
    %22 = vector.broadcast %cst_21 : f32 to vector<32x128xf32>
    %23 = arith.maximumf %21, %22 : vector<32x128xf32>
    %c0_22 = arith.constant 0 : index
    %c0_23 = arith.constant 0 : index
    %24 = vector.load %arg4[%c0_22, %c0_23] : memref<32x128xf32, #tpu.memory_space<vmem>>, vector<32x128xf32>
    tpu.vector_store %arg4[%c0_22, %c0_23], %23 {strides = array<i32>} : memref<32x128xf32, #tpu.memory_space<vmem>>, vector<32x128xf32>,
    return
  }
  func.func @transform_0(%arg0: i32) -> (i32, i32, i32) {
    %c0_i32 = arith.constant 0 : i32
    %c0_i32_0 = arith.constant 0 : i32
    %c0_i32_1 = arith.constant 0 : i32
    return %c0_i32, %arg0, %c0_i32_0 : i32, i32, i32
  }
  func.func @transform_1(%arg0: i32) -> (i32, i32) {
    %c0_i32 = arith.constant 0 : i32
    %c0_i32_0 = arith.constant 0 : i32
    %c0_i32_1 = arith.constant 0 : i32
    return %c0_i32, %c0_i32_0 : i32, i32
  }
  func.func @transform_2(%arg0: i32) -> (i32, i32) {
    %c0_i32 = arith.constant 0 : i32
    %c0_i32_0 = arith.constant 0 : i32
    %c0_i32_1 = arith.constant 0 : i32
    return %c0_i32, %c0_i32_0 : i32, i32
  }
  func.func @transform_3(%arg0: i32) -> (i32, i32) {
    %c0_i32 = arith.constant 0 : i32
    %c0_i32_0 = arith.constant 0 : i32
    return %arg0, %c0_i32 : i32, i32
  }
}

module attributes {stable_mosaic.version = 11 : i64} {
  func.func @_fc_head_kernel(%arg0: memref<2x320xbf16, #tpu.memory_space<vmem>>, %arg1: memref<320x64xbf16, #tpu.memory_space<vmem>>, %arg2: memref<1x64xf32, #tpu.memory_space<vmem>>, %arg3: memref<64x128xbf16, #tpu.memory_space<vmem>>, %arg4: memref<1x128xf32, #tpu.memory_space<vmem>>, %arg5: memref<2x128xf32, #tpu.memory_space<vmem>>) attributes {dimension_semantics = [], scalar_prefetch = 0 : i64, scratch_operands = 0 : i64, tpu.core_type = #tpu.core_type<tc>} {
    %c0 = arith.constant 0 : index
    %c0_0 = arith.constant 0 : index
    %0 = vector.load %arg0[%c0, %c0_0] : memref<2x320xbf16, #tpu.memory_space<vmem>>, vector<2x320xbf16>
    %c0_1 = arith.constant 0 : index
    %c0_2 = arith.constant 0 : index
    %1 = vector.load %arg1[%c0_1, %c0_2] : memref<320x64xbf16, #tpu.memory_space<vmem>>, vector<320x64xbf16>
    %cst = arith.constant dense<0.000000e+00> : vector<2x64xf32>
    %2 = tpu.matmul %0, %1, %cst {dimension_numbers = #tpu.dot_dimension_numbers<[1], [0], [0], [1], [0, 0, 1, 1], [], []>} : vector<2x320xbf16>, vector<320x64xbf16>, vector<2x64xf32> -> vector<2x64xf32>
    %c0_3 = arith.constant 0 : index
    %c0_4 = arith.constant 0 : index
    %3 = vector.load %arg2[%c0_3, %c0_4] : memref<1x64xf32, #tpu.memory_space<vmem>>, vector<1x64xf32>
    %4 = vector.broadcast %3 : vector<1x64xf32> to vector<2x64xf32>
    %5 = arith.addf %2, %4 : vector<2x64xf32>
    %cst_5 = arith.constant 0.000000e+00 : f32
    %6 = vector.broadcast %cst_5 : f32 to vector<2x64xf32>
    %7 = arith.maximumf %5, %6 : vector<2x64xf32>
    %8 = arith.truncf %7 : vector<2x64xf32> to vector<2x64xbf16>
    %c0_6 = arith.constant 0 : index
    %c0_7 = arith.constant 0 : index
    %9 = vector.load %arg3[%c0_6, %c0_7] : memref<64x128xbf16, #tpu.memory_space<vmem>>, vector<64x128xbf16>
    %cst_8 = arith.constant dense<0.000000e+00> : vector<2x128xf32>
    %10 = tpu.matmul %8, %9, %cst_8 {dimension_numbers = #tpu.dot_dimension_numbers<[1], [0], [0], [1], [0, 0, 1, 1], [], []>} : vector<2x64xbf16>, vector<64x128xbf16>, vector<2x128xf32> -> vector<2x128xf32>
    %c0_9 = arith.constant 0 : index
    %c0_10 = arith.constant 0 : index
    %11 = vector.load %arg4[%c0_9, %c0_10] : memref<1x128xf32, #tpu.memory_space<vmem>>, vector<1x128xf32>
    %12 = vector.broadcast %11 : vector<1x128xf32> to vector<2x128xf32>
    %13 = arith.addf %10, %12 : vector<2x128xf32>
    %cst_11 = arith.constant dense<0xFF800000> : vector<2xf32>
    %14 = vector.multi_reduction <maximumf>, %13, %cst_11 [1] : vector<2x128xf32> to vector<2xf32>
    %15 = vector.shape_cast %14 : vector<2xf32> to vector<2x1xf32>
    %16 = vector.broadcast %15 : vector<2x1xf32> to vector<2x128xf32>
    %17 = arith.subf %13, %16 : vector<2x128xf32>
    %18 = math.exp %17 : vector<2x128xf32>
    %cst_12 = arith.constant dense<0.000000e+00> : vector<2xf32>
    %19 = vector.multi_reduction <add>, %18, %cst_12 [1] : vector<2x128xf32> to vector<2xf32>
    %20 = vector.shape_cast %19 : vector<2xf32> to vector<2x1xf32>
    %21 = math.log %20 : vector<2x1xf32>
    %22 = vector.broadcast %21 : vector<2x1xf32> to vector<2x128xf32>
    %23 = arith.subf %17, %22 : vector<2x128xf32>
    %c0_13 = arith.constant 0 : index
    %c0_14 = arith.constant 0 : index
    %24 = vector.load %arg5[%c0_13, %c0_14] : memref<2x128xf32, #tpu.memory_space<vmem>>, vector<2x128xf32>
    tpu.vector_store %arg5[%c0_13, %c0_14], %23 {strides = array<i32>} : memref<2x128xf32, #tpu.memory_space<vmem>>, vector<2x128xf32>,
    return
  }
}

</mosaic_0001>

<bundles_post_ra>
// kernel: mynet_forward.3
= control target key start
LH: loop header
LB: loop body
LE: loop exit
PB: predicated region body
PF: predicated region fallthrough
CT: control target
= control target key end

     0   :  { %vm157_vm0 = vcmask 261120   ;;  %s2389_s1 = inlined_call_operand.vmem [shape: bf16[32,128], index: 1, kind: input, shape index: {}]   ;;  %s2390_s0 = inlined_call_operand.vmem [shape: bf16[4,288,32], index: 0, kind: input, shape index: {}]   ;;  %s2391_s2 = inlined_call_operand.vmem [shape: f32[1,128], index: 2, kind: input, shape index: {}]   ;;  %s2392_s3 = inlined_call_operand.vmem [shape: f32[288,128], index: 3, kind: output, shape index: {}]  }
   0x1   :  { %v1870_v0 = vld [vmem:[%s2389_s1 + $0x8] sm:$0xff]  ;;  %v1869_v1 = vld [vmem:[%s2389_s1] sm:$0xff]  ;;  %v1871_v3 = vld [vmem:[%s2390_s0 + $0x90] sm:$0xff] }
   0x2   :  { %218 = vmatpush.bf16.msra.mxu0 %v1870_v0  ;;  %498 = vmatpush.bf16.msra.mxu1 %v1870_v0  ;;  %v1851_v2 = vld [vmem:[%s2390_s0] sm:$0xff]  ;;  %v1907_v5 = vld [vmem:[%s2390_s0 + $0x1b0] sm:$0xff]  ;;  %v1852_v6 = vld [vmem:[%s2390_s0 + $0x8] sm:$0xff] }
   0x3   :  { %814 = vmatpush.bf16.msra.mxu2 %v1870_v0  ;;  %1130 = vmatpush.bf16.msra.mxu3 %v1870_v0  ;;  %v1889_v4 = vld [vmem:[%s2390_s0 + $0x120] sm:$0xff]  ;;  %v1872_v7 = vld [vmem:[%s2390_s0 + $0x98] sm:$0xff]  ;;  %v1890_v8 = vld [vmem:[%s2390_s0 + $0x128] sm:$0xff] }
   0x4   :  { %v1908_v9 = vld [vmem:[%s2390_s0 + $0x1b8] sm:$0xff]  ;;  %v1853_v10 = vld [vmem:[%s2390_s0 + $0x10] sm:$0xff]  ;;  %v1873_v11 = vld [vmem:[%s2390_s0 + $0xa0] sm:$0xff] }
   0x5   :  { %v1891_v12 = vld [vmem:[%s2390_s0 + $0x130] sm:$0xff]  ;;  %v1909_v13 = vld [vmem:[%s2390_s0 + $0x1c0] sm:$0xff]  ;;  %v1854_v14 = vld [vmem:[%s2390_s0 + $0x18] sm:$0xff] }
   0x6   :  { %219 = vmatpush.bf16.msra.mxu0 %v1869_v1  ;;  %499 = vmatpush.bf16.msra.mxu1 %v1869_v1  ;;  %v1874_v15 = vld [vmem:[%s2390_s0 + $0xa8] sm:$0xff]  ;;  %v1892_v16 = vld [vmem:[%s2390_s0 + $0x138] sm:$0xff]  ;;  %v1855_v18 = vld [vmem:[%s2390_s0 + $0x20] sm:$0xff] }
   0x7   :  { %815 = vmatpush.bf16.msra.mxu2 %v1869_v1  ;;  %1131 = vmatpush.bf16.msra.mxu3 %v1869_v1  ;;  %v1910_v17 = vld [vmem:[%s2390_s0 + $0x1c8] sm:$0xff]  ;;  %v1875_v19 = vld [vmem:[%s2390_s0 + $0xb0] sm:$0xff]  ;;  %v1893_v20 = vld [vmem:[%s2390_s0 + $0x140] sm:$0xff] }
   0x8   :  { %v1911_v21 = vld [vmem:[%s2390_s0 + $0x1d0] sm:$0xff]  ;;  %v1856_v22 = vld [vmem:[%s2390_s0 + $0x28] sm:$0xff]  ;;  %v1876_v23 = vld [vmem:[%s2390_s0 + $0xb8] sm:$0xff] }
   0x9   :  { %1455 = vmatmul.msk.bf16.vlgmr.msra.gmra.mxu0 %vm157_vm0, %v1851_v2  ;;  %1581 = vmatmul.msk.bf16.vlgmr.msra.gmra.mxu1 %vm157_vm0, %v1871_v3  ;;  %v1894_v24 = vld [vmem:[%s2390_s0 + $0x148] sm:$0xff]  ;;  %v1912_v25 = vld [vmem:[%s2390_s0 + $0x1d8] sm:$0xff]  ;;  %v1857_v26 = vld [vmem:[%s2390_s0 + $0x30] sm:$0xff] }
   0xa   :  { %1707 = vmatmul.msk.bf16.vlgmr.msra.gmra.mxu2 %vm157_vm0, %v1889_v4  ;;  %1833 = vmatmul.msk.bf16.vlgmr.msra.gmra.mxu3 %vm157_vm0, %v1907_v5  ;;  %v1877_v27 = vld [vmem:[%s2390_s0 + $0xc0] sm:$0xff]  ;;  %v1895_v28 = vld [vmem:[%s2390_s0 + $0x150] sm:$0xff]  ;;  %v1858_v30 = vld [vmem:[%s2390_s0 + $0x38] sm:$0xff] }
   0xb   :  { %v1913_v29 = vld [vmem:[%s2390_s0 + $0x1e0] sm:$0xff]  ;;  %v1878_v31 = vld [vmem:[%s2390_s0 + $0xc8] sm:$0xff]  ;;  %v1896_v32 = vld [vmem:[%s2390_s0 + $0x158] sm:$0xff] }
   0xc   :  { %v1914_v33 = vld [vmem:[%s2390_s0 + $0x1e8] sm:$0xff]  ;;  %v1859_v34 = vld [vmem:[%s2390_s0 + $0x40] sm:$0xff]  ;;  %v1879_v35 = vld [vmem:[%s2390_s0 + $0xd0] sm:$0xff] }
   0xd   :  { %v1897_v38 = vld [vmem:[%s2390_s0 + $0x160] sm:$0xff]  ;;  %v1915_v39 = vld [vmem:[%s2390_s0 + $0x1f0] sm:$0xff]  ;;  %v1860_v53 = vld [vmem:[%s2390_s0 + $0x48] sm:$0xff] }
   0xe   :  { %v2099_v44 = vld [vmem:[%s2391_s2] ss:$0 sm:$0xff]  ;;  %v1880_v54 = vld [vmem:[%s2390_s0 + $0xd8] sm:$0xff]  ;;  %v1898_v58 = vld [vmem:[%s2390_s0 + $0x168] sm:$0xff] }
   0xf   :  { %v1916_v59 = vld [vmem:[%s2390_s0 + $0x1f8] sm:$0xff] }
  0x19   :  { %1456 = vmatmul.msk.bf16.gmra.mxu0 %vm157_vm0, %v1852_v6  ;;  %1582 = vmatmul.msk.bf16.gmra.mxu1 %vm157_vm0, %v1872_v7 }
  0x1a   :  { %1708 = vmatmul.msk.bf16.gmra.mxu2 %vm157_vm0, %v1890_v8  ;;  %1834 = vmatmul.msk.bf16.gmra.mxu3 %vm157_vm0, %v1908_v9 }
  0x29   :  { %1457 = vmatmul.msk.bf16.gmra.mxu0 %vm157_vm0, %v1853_v10  ;;  %1583 = vmatmul.msk.bf16.gmra.mxu1 %vm157_vm0, %v1873_v11  ;;  %v1861_v11 = vld [vmem:[%s2390_s0 + $0x50] sm:$0xff] }
  0x2a   :  { %1709 = vmatmul.msk.bf16.gmra.mxu2 %vm157_vm0, %v1891_v12  ;;  %1835 = vmatmul.msk.bf16.gmra.mxu3 %vm157_vm0, %v1909_v13  ;;  %v1881_v12 = vld [vmem:[%s2390_s0 + $0xe0] sm:$0xff] }
  0x39   :  { %1458 = vmatmul.msk.bf16.gmra.mxu0 %vm157_vm0, %v1854_v14  ;;  %1584 = vmatmul.msk.bf16.gmra.mxu1 %vm157_vm0, %v1874_v15 }
  0x3a   :  { %1710 = vmatmul.msk.bf16.gmra.mxu2 %vm157_vm0, %v1892_v16  ;;  %1836 = vmatmul.msk.bf16.gmra.mxu3 %vm157_vm0, %v1910_v17  ;;  %v1899_v16 = vld [vmem:[%s2390_s0 + $0x170] sm:$0xff]  ;;  %v1917_v17 = vld [vmem:[%s2390_s0 + $0x200] sm:$0xff] }
  0x49   :  { %1459 = vmatmul.msk.bf16.gmra.mxu0 %vm157_vm0, %v1855_v18  ;;  %1585 = vmatmul.msk.bf16.gmra.mxu1 %vm157_vm0, %v1875_v19 }
  0x4a   :  { %1711 = vmatmul.msk.bf16.gmra.mxu2 %vm157_vm0, %v1893_v20  ;;  %1837 = vmatmul.msk.bf16.gmra.mxu3 %vm157_vm0, %v1911_v21 }
  0x59   :  { %1460 = vmatmul.msk.bf16.gmra.mxu0 %vm157_vm0, %v1856_v22  ;;  %1586 = vmatmul.msk.bf16.gmra.mxu1 %vm157_vm0, %v1876_v23 }
  0x5a   :  { %1712 = vmatmul.msk.bf16.gmra.mxu2 %vm157_vm0, %v1894_v24  ;;  %1838 = vmatmul.msk.bf16.gmra.mxu3 %vm157_vm0, %v1912_v25 }
  0x69   :  { %1461 = vmatmul.msk.bf16.gmra.mxu0 %vm157_vm0, %v1857_v26  ;;  %1587 = vmatmul.msk.bf16.gmra.mxu1 %vm157_vm0, %v1877_v27 }
  0x6a   :  { %1713 = vmatmul.msk.bf16.gmra.mxu2 %vm157_vm0, %v1895_v28  ;;  %1839 = vmatmul.msk.bf16.gmra.mxu3 %vm157_vm0, %v1913_v29 }
  0x79   :  { %1462 = vmatmul.msk.bf16.gmra.mxu0 %vm157_vm0, %v1858_v30  ;;  %1588 = vmatmul.msk.bf16.gmra.mxu1 %vm157_vm0, %v1878_v31 }
  0x7a   :  { %1714 = vmatmul.msk.bf16.gmra.mxu2 %vm157_vm0, %v1896_v32  ;;  %1840 = vmatmul.msk.bf16.gmra.mxu3 %vm157_vm0, %v1914_v33  ;;  %v1862_v33 = vld [vmem:[%s2390_s0 + $0x58] sm:$0xff] }
  0x86   :  { %v221_v36 = vpop.f32.mrf.mxu0  ;;  %v501_v37 = vpop.f32.mrf.mxu1 }
  0x87   :  { %v591_v40 = vmax.f32 %v221_v36, %v501_v37 }
  0x89   :  { %1463 = vmatmul.msk.bf16.gmra.mxu0 %vm157_vm0, %v1859_v34  ;;  %1589 = vmatmul.msk.bf16.gmra.mxu1 %vm157_vm0, %v1879_v35  ;;  %v1882_v34 = vld [vmem:[%s2390_s0 + $0xe8] sm:$0xff] }
  0x8a   :  { %1715 = vmatmul.msk.bf16.gmra.mxu2 %vm157_vm0, %v1897_v38  ;;  %1841 = vmatmul.msk.bf16.gmra.mxu3 %vm157_vm0, %v1915_v39  ;;  %v1900_v38 = vld [vmem:[%s2390_s0 + $0x178] sm:$0xff]  ;;  %v1918_v39 = vld [vmem:[%s2390_s0 + $0x208] sm:$0xff] }
  0x8d   :  { %v817_v41 = vpop.f32.mrf.mxu2  ;;  %v1133_v42 = vpop.f32.mrf.mxu3 }
  0x8e   :  { %v907_v43 = vmax.f32 %v591_v40, %v817_v41  ;;  %v223_v45 = vpop.f32.mrf.mxu0  ;;  %v503_v46 = vpop.f32.mrf.mxu1 }
  0x8f   :  { %v592_v50 = vmax.f32 %v223_v45, %v503_v46 }
  0x90   :  { %v1223_v47 = vmax.f32 %v907_v43, %v1133_v42 }
  0x92   :  { %v1263_v48 = vadd.f32 %v2099_v44, %v1223_v47 }
  0x94   :  { %v1299_v49 = vmax.f32 %v1263_v48, 0.0 }
  0x95   :  { %v819_v51 = vpop.f32.mrf.mxu2  ;;  %v1135_v52 = vpop.f32.mrf.mxu3 }
  0x96   :  { %1335 = vst [vmem:[%s2392_s3] sm:$0xff] %v1299_v49  ;;  %v908_v55 = vmax.f32 %v592_v50, %v819_v51  ;;  %v226_v56 = vpop.f32.mrf.mxu0  ;;  %v506_v57 = vpop.f32.mrf.mxu1 }
  0x97   :  { %v593_v62 = vmax.f32 %v226_v56, %v506_v57  ;;  %v1863_v56 = vld [vmem:[%s2390_s0 + $0x60] sm:$0xff]  ;;  %v1883_v57 = vld [vmem:[%s2390_s0 + $0xf0] sm:$0xff] }
  0x98   :  { %v1224_v60 = vmax.f32 %v908_v55, %v1135_v52 }
  0x99   :  { %1464 = vmatmul.msk.bf16.gmra.mxu0 %vm157_vm0, %v1860_v53  ;;  %1590 = vmatmul.msk.bf16.gmra.mxu1 %vm157_vm0, %v1880_v54 }
  0x9a   :  { %v1264_v61 = vadd.f32 %v2099_v44, %v1224_v60  ;;  %1716 = vmatmul.msk.bf16.gmra.mxu2 %vm157_vm0, %v1898_v58  ;;  %1842 = vmatmul.msk.bf16.gmra.mxu3 %vm157_vm0, %v1916_v59 }
  0x9c   :  { %v1300_v63 = vmax.f32 %v1264_v61, 0.0  ;;  %v1901_v61 = vld [vmem:[%s2390_s0 + $0x180] sm:$0xff] }
  0x9d   :  { %v822_v0 = vpop.f32.mrf.mxu2  ;;  %v1138_v1 = vpop.f32.mrf.mxu3 }
  0x9e   :  { %1336 = vst [vmem:[%s2392_s3 + $0x8] sm:$0xff] %v1300_v63  ;;  %v909_v2 = vmax.f32 %v593_v62, %v822_v0  ;;  %v228_v3 = vpop.f32.mrf.mxu0  ;;  %v508_v4 = vpop.f32.mrf.mxu1  ;;  %v1919_v62 = vld [vmem:[%s2390_s0 + $0x210] sm:$0xff] }
  0x9f   :  { %v594_v8 = vmax.f32 %v228_v3, %v508_v4 }
  0xa0   :  { %v1225_v5 = vmax.f32 %v909_v2, %v1138_v1 }
  0xa2   :  { %v1265_v6 = vadd.f32 %v2099_v44, %v1225_v5 }
  0xa4   :  { %v1301_v7 = vmax.f32 %v1265_v6, 0.0 }
  0xa5   :  { %v824_v9 = vpop.f32.mrf.mxu2  ;;  %v1140_v10 = vpop.f32.mrf.mxu3 }
  0xa6   :  { %1337 = vst [vmem:[%s2392_s3 + $0x10] sm:$0xff] %v1301_v7  ;;  %v910_v13 = vmax.f32 %v594_v8, %v824_v9  ;;  %v231_v14 = vpop.f32.mrf.mxu0  ;;  %v511_v15 = vpop.f32.mrf.mxu1 }
  0xa7   :  { %v595_v20 = vmax.f32 %v231_v14, %v511_v15  ;;  %v1864_v14 = vld [vmem:[%s2390_s0 + $0x68] sm:$0xff]  ;;  %v1884_v15 = vld [vmem:[%s2390_s0 + $0xf8] sm:$0xff] }
  0xa8   :  { %v1226_v18 = vmax.f32 %v910_v13, %v1140_v10 }
  0xa9   :  { %1465 = vmatmul.msk.bf16.gmra.mxu0 %vm157_vm0, %v1861_v11  ;;  %1591 = vmatmul.msk.bf16.gmra.mxu1 %vm157_vm0, %v1881_v12 }
  0xaa   :  { %v1266_v19 = vadd.f32 %v2099_v44, %v1226_v18  ;;  %1717 = vmatmul.msk.bf16.gmra.mxu2 %vm157_vm0, %v1899_v16  ;;  %1843 = vmatmul.msk.bf16.gmra.mxu3 %vm157_vm0, %v1917_v17 }
  0xac   :  { %v1302_v21 = vmax.f32 %v1266_v19, 0.0  ;;  %v1902_v19 = vld [vmem:[%s2390_s0 + $0x188] sm:$0xff] }
  0xad   :  { %v827_v22 = vpop.f32.mrf.mxu2  ;;  %v1143_v23 = vpop.f32.mrf.mxu3 }
  0xae   :  { %1338 = vst [vmem:[%s2392_s3 + $0x18] sm:$0xff] %v1302_v21  ;;  %v911_v24 = vmax.f32 %v595_v20, %v827_v22  ;;  %v233_v25 = vpop.f32.mrf.mxu0  ;;  %v513_v26 = vpop.f32.mrf.mxu1  ;;  %v1920_v20 = vld [vmem:[%s2390_s0 + $0x218] sm:$0xff] }
  0xaf   :  { %v596_v30 = vmax.f32 %v233_v25, %v513_v26 }
  0xb0   :  { %v1227_v27 = vmax.f32 %v911_v24, %v1143_v23 }
  0xb2   :  { %v1267_v28 = vadd.f32 %v2099_v44, %v1227_v27 }
  0xb4   :  { %v1303_v29 = vmax.f32 %v1267_v28, 0.0 }
  0xb5   :  { %v829_v31 = vpop.f32.mrf.mxu2  ;;  %v1145_v32 = vpop.f32.mrf.mxu3 }
  0xb6   :  { %1339 = vst [vmem:[%s2392_s3 + $0x20] sm:$0xff] %v1303_v29  ;;  %v912_v35 = vmax.f32 %v596_v30, %v829_v31  ;;  %v236_v36 = vpop.f32.mrf.mxu0  ;;  %v516_v37 = vpop.f32.mrf.mxu1 }
  0xb7   :  { %v597_v42 = vmax.f32 %v236_v36, %v516_v37  ;;  %v1865_v36 = vld [vmem:[%s2390_s0 + $0x70] sm:$0xff]  ;;  %v1885_v37 = vld [vmem:[%s2390_s0 + $0x100] sm:$0xff] }
  0xb8   :  { %v1228_v40 = vmax.f32 %v912_v35, %v1145_v32 }
  0xb9   :  { %1466 = vmatmul.msk.bf16.gmra.mxu0 %vm157_vm0, %v1862_v33  ;;  %1592 = vmatmul.msk.bf16.gmra.mxu1 %vm157_vm0, %v1882_v34 }
  0xba   :  { %v1268_v41 = vadd.f32 %v2099_v44, %v1228_v40  ;;  %1718 = vmatmul.msk.bf16.gmra.mxu2 %vm157_vm0, %v1900_v38  ;;  %1844 = vmatmul.msk.bf16.gmra.mxu3 %vm157_vm0, %v1918_v39 }
  0xbc   :  { %v1304_v43 = vmax.f32 %v1268_v41, 0.0  ;;  %v1903_v41 = vld [vmem:[%s2390_s0 + $0x190] sm:$0xff] }
  0xbd   :  { %v832_v45 = vpop.f32.mrf.mxu2  ;;  %v1148_v46 = vpop.f32.mrf.mxu3 }
  0xbe   :  { %1340 = vst [vmem:[%s2392_s3 + $0x28] sm:$0xff] %v1304_v43  ;;  %v913_v47 = vmax.f32 %v597_v42, %v832_v45  ;;  %v238_v48 = vpop.f32.mrf.mxu0  ;;  %v518_v49 = vpop.f32.mrf.mxu1  ;;  %v1921_v42 = vld [vmem:[%s2390_s0 + $0x220] sm:$0xff] }
  0xbf   :  { %v598_v53 = vmax.f32 %v238_v48, %v518_v49 }
  0xc0   :  { %v1229_v50 = vmax.f32 %v913_v47, %v1148_v46 }
  0xc2   :  { %v1269_v51 = vadd.f32 %v2099_v44, %v1229_v50 }
  0xc4   :  { %v1305_v52 = vmax.f32 %v1269_v51, 0.0 }
  0xc5   :  { %v834_v54 = vpop.f32.mrf.mxu2  ;;  %v1150_v55 = vpop.f32.mrf.mxu3 }
  0xc6   :  { %1341 = vst [vmem:[%s2392_s3 + $0x30] sm:$0xff] %v1305_v52  ;;  %v914_v58 = vmax.f32 %v598_v53, %v834_v54  ;;  %v241_v59 = vpop.f32.mrf.mxu0  ;;  %v521_v60 = vpop.f32.mrf.mxu1 }
  0xc7   :  { %v599_v1 = vmax.f32 %v241_v59, %v521_v60  ;;  %v1866_v59 = vld [vmem:[%s2390_s0 + $0x78] sm:$0xff]  ;;  %v1886_v60 = vld [vmem:[%s2390_s0 + $0x108] sm:$0xff] }
  0xc8   :  { %v1230_v63 = vmax.f32 %v914_v58, %v1150_v55 }
  0xc9   :  { %1467 = vmatmul.msk.bf16.gmra.mxu0 %vm157_vm0, %v1863_v56  ;;  %1593 = vmatmul.msk.bf16.gmra.mxu1 %vm157_vm0, %v1883_v57 }
  0xca   :  { %v1270_v0 = vadd.f32 %v2099_v44, %v1230_v63  ;;  %1719 = vmatmul.msk.bf16.gmra.mxu2 %vm157_vm0, %v1901_v61  ;;  %1845 = vmatmul.msk.bf16.gmra.mxu3 %vm157_vm0, %v1919_v62 }
  0xcc   :  { %v1306_v2 = vmax.f32 %v1270_v0, 0.0  ;;  %v1904_v0 = vld [vmem:[%s2390_s0 + $0x198] sm:$0xff] }
  0xcd   :  { %v837_v3 = vpop.f32.mrf.mxu2  ;;  %v1153_v4 = vpop.f32.mrf.mxu3 }
  0xce   :  { %1342 = vst [vmem:[%s2392_s3 + $0x38] sm:$0xff] %v1306_v2  ;;  %v915_v5 = vmax.f32 %v599_v1, %v837_v3  ;;  %v243_v6 = vpop.f32.mrf.mxu0  ;;  %v523_v7 = vpop.f32.mrf.mxu1  ;;  %v1922_v1 = vld [vmem:[%s2390_s0 + $0x228] sm:$0xff] }
  0xcf   :  { %v600_v11 = vmax.f32 %v243_v6, %v523_v7 }
  0xd0   :  { %v1231_v8 = vmax.f32 %v915_v5, %v1153_v4 }
  0xd2   :  { %v1271_v9 = vadd.f32 %v2099_v44, %v1231_v8 }
  0xd4   :  { %v1307_v10 = vmax.f32 %v1271_v9, 0.0 }
  0xd5   :  { %v839_v12 = vpop.f32.mrf.mxu2  ;;  %v1155_v13 = vpop.f32.mrf.mxu3 }
  0xd6   :  { %1343 = vst [vmem:[%s2392_s3 + $0x40] sm:$0xff] %v1307_v10  ;;  %v916_v16 = vmax.f32 %v600_v11, %v839_v12  ;;  %v246_v17 = vpop.f32.mrf.mxu0  ;;  %v526_v18 = vpop.f32.mrf.mxu1 }
  0xd7   :  { %v601_v23 = vmax.f32 %v246_v17, %v526_v18  ;;  %v1867_v17 = vld [vmem:[%s2390_s0 + $0x80] sm:$0xff]  ;;  %v1887_v18 = vld [vmem:[%s2390_s0 + $0x110] sm:$0xff] }
  0xd8   :  { %v1232_v21 = vmax.f32 %v916_v16, %v1155_v13 }
  0xd9   :  { %1468 = vmatmul.msk.bf16.gmra.mxu0 %vm157_vm0, %v1864_v14  ;;  %1594 = vmatmul.msk.bf16.gmra.mxu1 %vm157_vm0, %v1884_v15 }
  0xda   :  { %v1272_v22 = vadd.f32 %v2099_v44, %v1232_v21  ;;  %1720 = vmatmul.msk.bf16.gmra.mxu2 %vm157_vm0, %v1902_v19  ;;  %1846 = vmatmul.msk.bf16.gmra.mxu3 %vm157_vm0, %v1920_v20 }
  0xdc   :  { %v1308_v24 = vmax.f32 %v1272_v22, 0.0  ;;  %v1905_v22 = vld [vmem:[%s2390_s0 + $0x1a0] sm:$0xff] }
  0xdd   :  { %v842_v25 = vpop.f32.mrf.mxu2  ;;  %v1158_v26 = vpop.f32.mrf.mxu3 }
  0xde   :  { %1344 = vst [vmem:[%s2392_s3 + $0x48] sm:$0xff] %v1308_v24  ;;  %v917_v27 = vmax.f32 %v601_v23, %v842_v25  ;;  %v248_v28 = vpop.f32.mrf.mxu0  ;;  %v528_v29 = vpop.f32.mrf.mxu1  ;;  %v1923_v23 = vld [vmem:[%s2390_s0 + $0x230] sm:$0xff] }
  0xdf   :  { %v602_v33 = vmax.f32 %v248_v28, %v528_v29 }
  0xe0   :  { %v1233_v30 = vmax.f32 %v917_v27, %v1158_v26 }
  0xe2   :  { %v1273_v31 = vadd.f32 %v2099_v44, %v1233_v30 }
  0xe4   :  { %v1309_v32 = vmax.f32 %v1273_v31, 0.0 }
  0xe5   :  { %v844_v34 = vpop.f32.mrf.mxu2  ;;  %v1160_v35 = vpop.f32.mrf.mxu3 }
  0xe6   :  { %1345 = vst [vmem:[%s2392_s3 + $0x50] sm:$0xff] %v1309_v32  ;;  %v918_v38 = vmax.f32 %v602_v33, %v844_v34  ;;  %v251_v39 = vpop.f32.mrf.mxu0  ;;  %v531_v40 = vpop.f32.mrf.mxu1 }
  0xe7   :  { %v603_v46 = vmax.f32 %v251_v39, %v531_v40  ;;  %v1868_v39 = vld [vmem:[%s2390_s0 + $0x88] sm:$0xff]  ;;  %v1888_v40 = vld [vmem:[%s2390_s0 + $0x118] sm:$0xff] }
  0xe8   :  { %v1234_v43 = vmax.f32 %v918_v38, %v1160_v35 }
  0xe9   :  { %1469 = vmatmul.msk.bf16.gmra.mxu0 %vm157_vm0, %v1865_v36  ;;  %1595 = vmatmul.msk.bf16.gmra.mxu1 %vm157_vm0, %v1885_v37 }
  0xea   :  { %v1274_v45 = vadd.f32 %v2099_v44, %v1234_v43  ;;  %1721 = vmatmul.msk.bf16.gmra.mxu2 %vm157_vm0, %v1903_v41  ;;  %1847 = vmatmul.msk.bf16.gmra.mxu3 %vm157_vm0, %v1921_v42 }
  0xec   :  { %v1310_v47 = vmax.f32 %v1274_v45, 0.0  ;;  %v1906_v45 = vld [vmem:[%s2390_s0 + $0x1a8] sm:$0xff] }
  0xed   :  { %v847_v48 = vpop.f32.mrf.mxu2  ;;  %v1163_v49 = vpop.f32.mrf.mxu3 }
  0xee   :  { %1346 = vst [vmem:[%s2392_s3 + $0x58] sm:$0xff] %v1310_v47  ;;  %v919_v50 = vmax.f32 %v603_v46, %v847_v48  ;;  %v253_v51 = vpop.f32.mrf.mxu0  ;;  %v533_v52 = vpop.f32.mrf.mxu1  ;;  %v1924_v46 = vld [vmem:[%s2390_s0 + $0x238] sm:$0xff] }
  0xef   :  { %v604_v56 = vmax.f32 %v253_v51, %v533_v52 }
  0xf0   :  { %v1235_v53 = vmax.f32 %v919_v50, %v1163_v49 }
  0xf2   :  { %v1275_v54 = vadd.f32 %v2099_v44, %v1235_v53 }
  0xf4   :  { %v1311_v55 = vmax.f32 %v1275_v54, 0.0 }
  0xf5   :  { %v849_v57 = vpop.f32.mrf.mxu2  ;;  %v1165_v58 = vpop.f32.mrf.mxu3 }
  0xf6   :  { %1347 = vst [vmem:[%s2392_s3 + $0x60] sm:$0xff] %v1311_v55  ;;  %v920_v61 = vmax.f32 %v604_v56, %v849_v57  ;;  %v256_v62 = vpop.f32.mrf.mxu0  ;;  %v536_v63 = vpop.f32.mrf.mxu1 }
  0xf7   :  { %v605_v4 = vmax.f32 %v256_v62, %v536_v63 }
  0xf8   :  { %v1236_v2 = vmax.f32 %v920_v61, %v1165_v58 }
  0xf9   :  { %1470 = vmatmul.msk.bf16.gmra.mxu0 %vm157_vm0, %v1866_v59  ;;  %1596 = vmatmul.msk.bf16.gmra.mxu1 %vm157_vm0, %v1886_v60 }
  0xfa   :  { %v1276_v3 = vadd.f32 %v2099_v44, %v1236_v2  ;;  %1722 = vmatmul.msk.bf16.gmra.mxu2 %vm157_vm0, %v1904_v0  ;;  %1848 = vmatmul.msk.bf16.gmra.mxu3 %vm157_vm0, %v1922_v1 }
  0xfc   :  { %v1312_v5 = vmax.f32 %v1276_v3, 0.0 }
  0xfd   :  { %v852_v6 = vpop.f32.mrf.mxu2  ;;  %v1168_v7 = vpop.f32.mrf.mxu3 }
  0xfe   :  { %1348 = vst [vmem:[%s2392_s3 + $0x68] sm:$0xff] %v1312_v5  ;;  %v921_v8 = vmax.f32 %v605_v4, %v852_v6  ;;  %v258_v9 = vpop.f32.mrf.mxu0  ;;  %v538_v10 = vpop.f32.mrf.mxu1 }
  0xff   :  { %v606_v14 = vmax.f32 %v258_v9, %v538_v10 }
 0x100   :  { %v1237_v11 = vmax.f32 %v921_v8, %v1168_v7 }
 0x102   :  { %v1277_v12 = vadd.f32 %v2099_v44, %v1237_v11 }
 0x104   :  { %v1313_v13 = vmax.f32 %v1277_v12, 0.0 }
 0x105   :  { %v854_v15 = vpop.f32.mrf.mxu2  ;;  %v1170_v16 = vpop.f32.mrf.mxu3 }
 0x106   :  { %1349 = vst [vmem:[%s2392_s3 + $0x70] sm:$0xff] %v1313_v13  ;;  %v922_v19 = vmax.f32 %v606_v14, %v854_v15  ;;  %v261_v20 = vpop.f32.mrf.mxu0  ;;  %v541_v21 = vpop.f32.mrf.mxu1 }
 0x107   :  { %v607_v26 = vmax.f32 %v261_v20, %v541_v21 }
 0x108   :  { %v1238_v24 = vmax.f32 %v922_v19, %v1170_v16 }
 0x109   :  { %1471 = vmatmul.msk.bf16.gmra.mxu0 %vm157_vm0, %v1867_v17  ;;  %1597 = vmatmul.msk.bf16.gmra.mxu1 %vm157_vm0, %v1887_v18 }
 0x10a   :  { %v1278_v25 = vadd.f32 %v2099_v44, %v1238_v24  ;;  %1723 = vmatmul.msk.bf16.gmra.mxu2 %vm157_vm0, %v1905_v22  ;;  %1849 = vmatmul.msk.bf16.gmra.mxu3 %vm157_vm0, %v1923_v23 }
 0x10c   :  { %v1314_v27 = vmax.f32 %v1278_v25, 0.0 }
 0x10d   :  { %v857_v28 = vpop.f32.mrf.mxu2  ;;  %v1173_v29 = vpop.f32.mrf.mxu3 }
 0x10e   :  { %1350 = vst [vmem:[%s2392_s3 + $0x78] sm:$0xff] %v1314_v27  ;;  %v923_v30 = vmax.f32 %v607_v26, %v857_v28  ;;  %v263_v31 = vpop.f32.mrf.mxu0  ;;  %v543_v32 = vpop.f32.mrf.mxu1 }
 0x10f   :  { %v608_v36 = vmax.f32 %v263_v31, %v543_v32 }
 0x110   :  { %v1239_v33 = vmax.f32 %v923_v30, %v1173_v29 }
 0x112   :  { %v1279_v34 = vadd.f32 %v2099_v44, %v1239_v33 }
 0x114   :  { %v1315_v35 = vmax.f32 %v1279_v34, 0.0 }
 0x115   :  { %v859_v37 = vpop.f32.mrf.mxu2  ;;  %v1175_v38 = vpop.f32.mrf.mxu3 }
 0x116   :  { %1351 = vst [vmem:[%s2392_s3 + $0x80] sm:$0xff] %v1315_v35  ;;  %v924_v41 = vmax.f32 %v608_v36, %v859_v37  ;;  %v266_v42 = vpop.f32.mrf.mxu0  ;;  %v546_v43 = vpop.f32.mrf.mxu1 }
 0x117   :  { %v609_v49 = vmax.f32 %v266_v42, %v546_v43 }
 0x118   :  { %v1240_v47 = vmax.f32 %v924_v41, %v1175_v38 }
 0x119   :  { %1472 = vmatmul.msk.bf16.gmra.mxu0 %vm157_vm0, %v1868_v39  ;;  %1598 = vmatmul.msk.bf16.gmra.mxu1 %vm157_vm0, %v1888_v40 }
 0x11a   :  { %v1280_v48 = vadd.f32 %v2099_v44, %v1240_v47  ;;  %1724 = vmatmul.msk.bf16.gmra.mxu2 %vm157_vm0, %v1906_v45  ;;  %1850 = vmatmul.msk.bf16.gmra.mxu3 %vm157_vm0, %v1924_v46 }
 0x11c   :  { %v1316_v50 = vmax.f32 %v1280_v48, 0.0 }
 0x11d   :  { %v862_v51 = vpop.f32.mrf.mxu2  ;;  %v1178_v52 = vpop.f32.mrf.mxu3 }
 0x11e   :  { %1352 = vst [vmem:[%s2392_s3 + $0x88] sm:$0xff] %v1316_v50  ;;  %v925_v53 = vmax.f32 %v609_v49, %v862_v51  ;;  %v268_v54 = vpop.f32.mrf.mxu0  ;;  %v548_v55 = vpop.f32.mrf.mxu1 }
 0x11f   :  { %v610_v59 = vmax.f32 %v268_v54, %v548_v55 }
 0x120   :  { %v1241_v56 = vmax.f32 %v925_v53, %v1178_v52 }
 0x122   :  { %v1281_v57 = vadd.f32 %v2099_v44, %v1241_v56 }
 0x124   :  { %v1317_v58 = vmax.f32 %v1281_v57, 0.0 }
 0x125   :  { %v864_v60 = vpop.f32.mrf.mxu2  ;;  %v1180_v61 = vpop.f32.mrf.mxu3 }
 0x126   :  { %1353 = vst [vmem:[%s2392_s3 + $0x90] sm:$0xff] %v1317_v58  ;;  %v926_v62 = vmax.f32 %v610_v59, %v864_v60  ;;  %v271_v63 = vpop.f32.mrf.mxu0  ;;  %v551_v0 = vpop.f32.mrf.mxu1 }
 0x127   :  { %v611_v3 = vmax.f32 %v271_v63, %v551_v0 }
 0x128   :  { %v1242_v1 = vmax.f32 %v926_v62, %v1180_v61 }
 0x12a   :  { %v1282_v2 = vadd.f32 %v2099_v44, %v1242_v1 }
 0x12c   :  { %v1318_v4 = vmax.f32 %v1282_v2, 0.0 }
 0x12d   :  { %v867_v5 = vpop.f32.mrf.mxu2  ;;  %v1183_v6 = vpop.f32.mrf.mxu3 }
 0x12e   :  { %1354 = vst [vmem:[%s2392_s3 + $0x98] sm:$0xff] %v1318_v4  ;;  %v927_v7 = vmax.f32 %v611_v3, %v867_v5  ;;  %v273_v8 = vpop.f32.mrf.mxu0  ;;  %v553_v9 = vpop.f32.mrf.mxu1 }
 0x12f   :  { %v612_v13 = vmax.f32 %v273_v8, %v553_v9 }
 0x130   :  { %v1243_v10 = vmax.f32 %v927_v7, %v1183_v6 }
 0x132   :  { %v1283_v11 = vadd.f32 %v2099_v44, %v1243_v10 }
 0x134   :  { %v1319_v12 = vmax.f32 %v1283_v11, 0.0 }
 0x135   :  { %v869_v14 = vpop.f32.mrf.mxu2  ;;  %v1185_v15 = vpop.f32.mrf.mxu3 }
 0x136   :  { %1355 = vst [vmem:[%s2392_s3 + $0xa0] sm:$0xff] %v1319_v12  ;;  %v928_v16 = vmax.f32 %v612_v13, %v869_v14  ;;  %v276_v17 = vpop.f32.mrf.mxu0  ;;  %v556_v18 = vpop.f32.mrf.mxu1 }
 0x137   :  { %v613_v21 = vmax.f32 %v276_v17, %v556_v18 }
 0x138   :  { %v1244_v19 = vmax.f32 %v928_v16, %v1185_v15 }
 0x13a   :  { %v1284_v20 = vadd.f32 %v2099_v44, %v1244_v19 }
 0x13c   :  { %v1320_v22 = vmax.f32 %v1284_v20, 0.0 }
 0x13d   :  { %v872_v23 = vpop.f32.mrf.mxu2  ;;  %v1188_v24 = vpop.f32.mrf.mxu3 }
 0x13e   :  { %1356 = vst [vmem:[%s2392_s3 + $0xa8] sm:$0xff] %v1320_v22  ;;  %v929_v25 = vmax.f32 %v613_v21, %v872_v23  ;;  %v278_v26 = vpop.f32.mrf.mxu0  ;;  %v558_v27 = vpop.f32.mrf.mxu1 }
 0x13f   :  { %v614_v31 = vmax.f32 %v278_v26, %v558_v27 }
 0x140   :  { %v1245_v28 = vmax.f32 %v929_v25, %v1188_v24 }
 0x142   :  { %v1285_v29 = vadd.f32 %v2099_v44, %v1245_v28 }
 0x144   :  { %v1321_v30 = vmax.f32 %v1285_v29, 0.0 }
 0x145   :  { %v874_v32 = vpop.f32.mrf.mxu2  ;;  %v1190_v33 = vpop.f32.mrf.mxu3 }
 0x146   :  { %1357 = vst [vmem:[%s2392_s3 + $0xb0] sm:$0xff] %v1321_v30  ;;  %v930_v34 = vmax.f32 %v614_v31, %v874_v32  ;;  %v281_v35 = vpop.f32.mrf.mxu0  ;;  %v561_v36 = vpop.f32.mrf.mxu1 }
 0x147   :  { %v615_v39 = vmax.f32 %v281_v35, %v561_v36 }
 0x148   :  { %v1246_v37 = vmax.f32 %v930_v34, %v1190_v33 }
 0x14a   :  { %v1286_v38 = vadd.f32 %v2099_v44, %v1246_v37 }
 0x14c   :  { %v1322_v40 = vmax.f32 %v1286_v38, 0.0 }
 0x14d   :  { %v877_v41 = vpop.f32.mrf.mxu2  ;;  %v1193_v42 = vpop.f32.mrf.mxu3 }
 0x14e   :  { %1358 = vst [vmem:[%s2392_s3 + $0xb8] sm:$0xff] %v1322_v40  ;;  %v931_v43 = vmax.f32 %v615_v39, %v877_v41  ;;  %v283_v45 = vpop.f32.mrf.mxu0  ;;  %v563_v46 = vpop.f32.mrf.mxu1 }
 0x14f   :  { %v616_v50 = vmax.f32 %v283_v45, %v563_v46 }
 0x150   :  { %v1247_v47 = vmax.f32 %v931_v43, %v1193_v42 }
 0x152   :  { %v1287_v48 = vadd.f32 %v2099_v44, %v1247_v47 }
 0x154   :  { %v1323_v49 = vmax.f32 %v1287_v48, 0.0 }
 0x155   :  { %v879_v51 = vpop.f32.mrf.mxu2  ;;  %v1195_v52 = vpop.f32.mrf.mxu3 }
 0x156   :  { %1359 = vst [vmem:[%s2392_s3 + $0xc0] sm:$0xff] %v1323_v49  ;;  %v932_v53 = vmax.f32 %v616_v50, %v879_v51  ;;  %v286_v54 = vpop.f32.mrf.mxu0  ;;  %v566_v55 = vpop.f32.mrf.mxu1 }
 0x157   :  { %v617_v58 = vmax.f32 %v286_v54, %v566_v55 }
 0x158   :  { %v1248_v56 = vmax.f32 %v932_v53, %v1195_v52 }
 0x15a   :  { %v1288_v57 = vadd.f32 %v2099_v44, %v1248_v56 }
 0x15c   :  { %v1324_v59 = vmax.f32 %v1288_v57, 0.0 }
 0x15d   :  { %v882_v60 = vpop.f32.mrf.mxu2  ;;  %v1198_v61 = vpop.f32.mrf.mxu3 }
 0x15e   :  { %1360 = vst [vmem:[%s2392_s3 + $0xc8] sm:$0xff] %v1324_v59  ;;  %v933_v62 = vmax.f32 %v617_v58, %v882_v60  ;;  %v288_v63 = vpop.f32.mrf.mxu0  ;;  %v568_v0 = vpop.f32.mrf.mxu1 }
 0x15f   :  { %v618_v4 = vmax.f32 %v288_v63, %v568_v0 }
 0x160   :  { %v1249_v1 = vmax.f32 %v933_v62, %v1198_v61 }
 0x162   :  { %v1289_v2 = vadd.f32 %v2099_v44, %v1249_v1 }
 0x164   :  { %v1325_v3 = vmax.f32 %v1289_v2, 0.0 }
 0x165   :  { %v884_v5 = vpop.f32.mrf.mxu2  ;;  %v1200_v6 = vpop.f32.mrf.mxu3 }
 0x166   :  { %1361 = vst [vmem:[%s2392_s3 + $0xd0] sm:$0xff] %v1325_v3  ;;  %v934_v7 = vmax.f32 %v618_v4, %v884_v5  ;;  %v291_v8 = vpop.f32.mrf.mxu0  ;;  %v571_v9 = vpop.f32.mrf.mxu1 }
 0x167   :  { %v619_v12 = vmax.f32 %v291_v8, %v571_v9 }
 0x168   :  { %v1250_v10 = vmax.f32 %v934_v7, %v1200_v6 }
 0x16a   :  { %v1290_v11 = vadd.f32 %v2099_v44, %v1250_v10 }
 0x16c   :  { %v1326_v13 = vmax.f32 %v1290_v11, 0.0 }
 0x16d   :  { %v887_v14 = vpop.f32.mrf.mxu2  ;;  %v1203_v15 = vpop.f32.mrf.mxu3 }
 0x16e   :  { %1362 = vst [vmem:[%s2392_s3 + $0xd8] sm:$0xff] %v1326_v13  ;;  %v935_v16 = vmax.f32 %v619_v12, %v887_v14  ;;  %v293_v17 = vpop.f32.mrf.mxu0  ;;  %v573_v18 = vpop.f32.mrf.mxu1 }
 0x16f   :  { %v620_v22 = vmax.f32 %v293_v17, %v573_v18 }
 0x170   :  { %v1251_v19 = vmax.f32 %v935_v16, %v1203_v15 }
 0x172   :  { %v1291_v20 = vadd.f32 %v2099_v44, %v1251_v19 }
 0x174   :  { %v1327_v21 = vmax.f32 %v1291_v20, 0.0 }
 0x175   :  { %v889_v23 = vpop.f32.mrf.mxu2  ;;  %v1205_v24 = vpop.f32.mrf.mxu3 }
 0x176   :  { %1363 = vst [vmem:[%s2392_s3 + $0xe0] sm:$0xff] %v1327_v21  ;;  %v936_v25 = vmax.f32 %v620_v22, %v889_v23  ;;  %v296_v26 = vpop.f32.mrf.mxu0  ;;  %v576_v27 = vpop.f32.mrf.mxu1 }
 0x177   :  { %v621_v30 = vmax.f32 %v296_v26, %v576_v27 }
 0x178   :  { %v1252_v28 = vmax.f32 %v936_v25, %v1205_v24 }
 0x17a   :  { %v1292_v29 = vadd.f32 %v2099_v44, %v1252_v28 }
 0x17c   :  { %v1328_v31 = vmax.f32 %v1292_v29, 0.0 }
 0x17d   :  { %v892_v32 = vpop.f32.mrf.mxu2  ;;  %v1208_v33 = vpop.f32.mrf.mxu3 }
 0x17e   :  { %1364 = vst [vmem:[%s2392_s3 + $0xe8] sm:$0xff] %v1328_v31  ;;  %v937_v34 = vmax.f32 %v621_v30, %v892_v32  ;;  %v298_v35 = vpop.f32.mrf.mxu0  ;;  %v578_v36 = vpop.f32.mrf.mxu1 }
 0x17f   :  { %v622_v40 = vmax.f32 %v298_v35, %v578_v36 }
 0x180   :  { %v1253_v37 = vmax.f32 %v937_v34, %v1208_v33 }
 0x182   :  { %v1293_v38 = vadd.f32 %v2099_v44, %v1253_v37 }
 0x184   :  { %v1329_v39 = vmax.f32 %v1293_v38, 0.0 }
 0x185   :  { %v894_v41 = vpop.f32.mrf.mxu2  ;;  %v1210_v42 = vpop.f32.mrf.mxu3 }
 0x186   :  { %1365 = vst [vmem:[%s2392_s3 + $0xf0] sm:$0xff] %v1329_v39  ;;  %v938_v43 = vmax.f32 %v622_v40, %v894_v41  ;;  %v301_v45 = vpop.f32.mrf.mxu0  ;;  %v581_v46 = vpop.f32.mrf.mxu1 }
 0x187   :  { %v623_v49 = vmax.f32 %v301_v45, %v581_v46 }
 0x188   :  { %v1254_v47 = vmax.f32 %v938_v43, %v1210_v42 }
 0x18a   :  { %v1294_v48 = vadd.f32 %v2099_v44, %v1254_v47 }
 0x18c   :  { %v1330_v50 = vmax.f32 %v1294_v48, 0.0 }
 0x18d   :  { %v897_v51 = vpop.f32.mrf.mxu2  ;;  %v1213_v52 = vpop.f32.mrf.mxu3 }
 0x18e   :  { %1366 = vst [vmem:[%s2392_s3 + $0xf8] sm:$0xff] %v1330_v50  ;;  %v939_v53 = vmax.f32 %v623_v49, %v897_v51  ;;  %v303_v54 = vpop.f32.mrf.mxu0  ;;  %v583_v55 = vpop.f32.mrf.mxu1 }
 0x18f   :  { %v624_v59 = vmax.f32 %v303_v54, %v583_v55 }
 0x190   :  { %v1255_v56 = vmax.f32 %v939_v53, %v1213_v52 }
 0x192   :  { %v1295_v57 = vadd.f32 %v2099_v44, %v1255_v56 }
 0x194   :  { %v1331_v58 = vmax.f32 %v1295_v57, 0.0 }
 0x195   :  { %v899_v60 = vpop.f32.mrf.mxu2  ;;  %v1215_v61 = vpop.f32.mrf.mxu3 }
 0x196   :  { %1367 = vst [vmem:[%s2392_s3 + $0x100] sm:$0xff] %v1331_v58  ;;  %v940_v62 = vmax.f32 %v624_v59, %v899_v60  ;;  %v306_v63 = vpop.f32.mrf.mxu0  ;;  %v586_v0 = vpop.f32.mrf.mxu1 }
 0x197   :  { %v625_v3 = vmax.f32 %v306_v63, %v586_v0 }
 0x198   :  { %v1256_v1 = vmax.f32 %v940_v62, %v1215_v61 }
 0x19a   :  { %v1296_v2 = vadd.f32 %v2099_v44, %v1256_v1 }
 0x19c   :  { %v1332_v4 = vmax.f32 %v1296_v2, 0.0 }
 0x19d   :  { %v902_v5 = vpop.f32.mrf.mxu2  ;;  %v1218_v6 = vpop.f32.mrf.mxu3 }
 0x19e   :  { %1368 = vst [vmem:[%s2392_s3 + $0x108] sm:$0xff] %v1332_v4  ;;  %v941_v7 = vmax.f32 %v625_v3, %v902_v5  ;;  %v308_v9 = vpop.f32.mrf.mxu0  ;;  %v588_v10 = vpop.f32.mrf.mxu1 }
 0x19f   :  { %v626_v13 = vmax.f32 %v308_v9, %v588_v10 }
 0x1a0   :  { %v1257_v8 = vmax.f32 %v941_v7, %v1218_v6 }
 0x1a2   :  { %v1297_v11 = vadd.f32 %v2099_v44, %v1257_v8 }
 0x1a4   :  { %v1333_v12 = vmax.f32 %v1297_v11, 0.0 }
 0x1a5   :  { %v904_v14 = vpop.f32.mrf.mxu2  ;;  %v1220_v16 = vpop.f32.mrf.mxu3 }
 0x1a6   :  { %1369 = vst [vmem:[%s2392_s3 + $0x110] sm:$0xff] %v1333_v12  ;;  %v942_v15 = vmax.f32 %v626_v13, %v904_v14 }
 0x1a8   :  { %v1258_v17 = vmax.f32 %v942_v15, %v1220_v16 }
 0x1aa   :  { %v1298_v18 = vadd.f32 %v2099_v44, %v1258_v17 }
 0x1ac   :  { %v1334_v19 = vmax.f32 %v1298_v18, 0.0 }
 0x1ae   :  { %1370 = vst [vmem:[%s2392_s3 + $0x118] sm:$0xff] %v1334_v19 }

// kernel: mynet_forward.4
= control target key start
LH: loop header
LB: loop body
LE: loop exit
PB: predicated region body
PF: predicated region fallthrough
CT: control target
= control target key end

     0   :  { %s873_s1 = inlined_call_operand.vmem [shape: bf16[256,128], index: 1, kind: input, shape index: {}]   ;;  %s874_s0 = inlined_call_operand.vmem [shape: bf16[4,32,256], index: 0, kind: input, shape index: {}]   ;;  %s875_s2 = inlined_call_operand.vmem [shape: f32[1,128], index: 2, kind: input, shape index: {}]   ;;  %s876_s3 = inlined_call_operand.vmem [shape: f32[32,128], index: 3, kind: output, shape index: {}]  }
   0x1   :  { %v621_v0 = vld [vmem:[%s873_s1 + $0x38] sm:$0xff]  ;;  %v633_v2 = vld [vmem:[%s873_s1 + $0x30] sm:$0xff]  ;;  %v647_v4 = vld [vmem:[%s873_s1 + $0x28] sm:$0xff] }
   0x2   :  { %v626_v1 = vld [vmem:[%s873_s1 + $0x78] sm:$0xff]  ;;  %166 = vmatpush.bf16.msra.mxu0 %v621_v0  ;;  %v638_v3 = vld [vmem:[%s873_s1 + $0x70] sm:$0xff]  ;;  %229 = vmatpush.bf16.msra.mxu2 %v621_v0  ;;  %v652_v5 = vld [vmem:[%s873_s1 + $0x68] sm:$0xff] }
   0x3   :  { %185 = vmatpush.bf16.msra.mxu1 %v626_v1  ;;  %248 = vmatpush.bf16.msra.mxu3 %v626_v1  ;;  %v661_v6 = vld [vmem:[%s873_s1 + $0x20] sm:$0xff]  ;;  %v675_v8 = vld [vmem:[%s873_s1 + $0x18] sm:$0xff]  ;;  %v689_v10 = vld [vmem:[%s873_s1 + $0x10] sm:$0xff] }
   0x4   :  { %v666_v7 = vld [vmem:[%s873_s1 + $0x60] sm:$0xff]  ;;  %v680_v9 = vld [vmem:[%s873_s1 + $0x58] sm:$0xff]  ;;  %v694_v11 = vld [vmem:[%s873_s1 + $0x50] sm:$0xff] }
   0x5   :  { %v703_v12 = vld [vmem:[%s873_s1 + $0x8] sm:$0xff]  ;;  %v715_v14 = vld [vmem:[%s873_s1] sm:$0xff]  ;;  %v435_v28 = vld [vmem:[%s874_s0 + $0x10] sm:$0xf] }
   0x6   :  { %167 = vmatpush.bf16.msra.mxu0 %v633_v2  ;;  %230 = vmatpush.bf16.msra.mxu2 %v633_v2  ;;  %v708_v13 = vld [vmem:[%s873_s1 + $0x48] sm:$0xff]  ;;  %v720_v15 = vld [vmem:[%s873_s1 + $0x40] sm:$0xff]  ;;  %v568_v29 = vld [vmem:[%s874_s0 + $0x14] sm:$0xf0] }
   0x7   :  { %186 = vmatpush.bf16.msra.mxu1 %v638_v3  ;;  %249 = vmatpush.bf16.msra.mxu3 %v638_v3  ;;  %v427_v16 = vld [vmem:[%s874_s0] sm:$0xf]  ;;  %v566_v17 = vld [vmem:[%s874_s0 + $0x4] sm:$0xf0]  ;;  %v565_v18 = vld [vmem:[%s874_s0 + $0x4] sm:$0xf]  ;;  %v436_v36 = vor.u32 %v568_v29, %v435_v28 }
   0x8   :  { %v429_v19 = vld [vmem:[%s874_s0 + $0x8] sm:$0xf0]  ;;  %v511_v20 = vld [vmem:[%s874_s0 + $0x20] sm:$0xf]  ;;  %v586_v21 = vld [vmem:[%s874_s0 + $0x24] sm:$0xf0]  ;;  %v428_v24 = vor.u32 %v566_v17, %v427_v16 }
   0x9   :  { %v585_v22 = vld [vmem:[%s874_s0 + $0x24] sm:$0xf]  ;;  %v513_v23 = vld [vmem:[%s874_s0 + $0x28] sm:$0xf0]  ;;  %v432_v25 = vor.u32 %v565_v18, %v429_v19  ;;  %v512_v26 = vor.u32 %v586_v21, %v511_v20  ;;  %v567_v30 = vld [vmem:[%s874_s0 + $0x14] sm:$0xf] }
   0xa   :  { %168 = vmatpush.bf16.msra.mxu0 %v647_v4  ;;  %231 = vmatpush.bf16.msra.mxu2 %v647_v4  ;;  %v516_v27 = vor.u32 %v585_v22, %v513_v23  ;;  %v437_v31 = vld [vmem:[%s874_s0 + $0x18] sm:$0xf0]  ;;  %v519_v32 = vld [vmem:[%s874_s0 + $0x30] sm:$0xf]  ;;  %v588_v33 = vld [vmem:[%s874_s0 + $0x34] sm:$0xf0] }
   0xb   :  { %187 = vmatpush.bf16.msra.mxu1 %v652_v5  ;;  %250 = vmatpush.bf16.msra.mxu3 %v652_v5  ;;  %v587_v34 = vld [vmem:[%s874_s0 + $0x34] sm:$0xf]  ;;  %v521_v35 = vld [vmem:[%s874_s0 + $0x38] sm:$0xf0]  ;;  %v440_v37 = vor.u32 %v567_v30, %v437_v31  ;;  %v520_v38 = vor.u32 %v588_v33, %v519_v32  ;;  %v531_v40 = vld [vmem:[%s874_s0 + $0x40] sm:$0xf] }
   0xc   :  { %v524_v39 = vor.u32 %v587_v34, %v521_v35  ;;  %v590_v41 = vld [vmem:[%s874_s0 + $0x44] sm:$0xf0]  ;;  %v589_v42 = vld [vmem:[%s874_s0 + $0x44] sm:$0xf]  ;;  %v533_v43 = vld [vmem:[%s874_s0 + $0x48] sm:$0xf0] }
   0xd   :  { %v551_v44 = vld [vmem:[%s874_s0 + $0x60] sm:$0xf]  ;;  %v594_v45 = vld [vmem:[%s874_s0 + $0x64] sm:$0xf0]  ;;  %v593_v46 = vld [vmem:[%s874_s0 + $0x64] sm:$0xf]  ;;  %v532_v48 = vor.u32 %v590_v41, %v531_v40  ;;  %v536_v49 = vor.u32 %v589_v42, %v533_v43 }
   0xe   :  { %169 = vmatpush.bf16.msra.mxu0 %v661_v6  ;;  %232 = vmatpush.bf16.msra.mxu2 %v661_v6  ;;  %v553_v47 = vld [vmem:[%s874_s0 + $0x68] sm:$0xf0]  ;;  %v552_v50 = vor.u32 %v594_v45, %v551_v44  ;;  %v539_v52 = vld [vmem:[%s874_s0 + $0x50] sm:$0xf]  ;;  %v592_v53 = vld [vmem:[%s874_s0 + $0x54] sm:$0xf0] }
   0xf   :  { %188 = vmatpush.bf16.msra.mxu1 %v666_v7  ;;  %251 = vmatpush.bf16.msra.mxu3 %v666_v7  ;;  %v556_v51 = vor.u32 %v593_v46, %v553_v47  ;;  %v591_v54 = vld [vmem:[%s874_s0 + $0x54] sm:$0xf]  ;;  %v541_v55 = vld [vmem:[%s874_s0 + $0x58] sm:$0xf0]  ;;  %v559_v56 = vld [vmem:[%s874_s0 + $0x70] sm:$0xf]  ;;  %v540_v60 = vor.u32 %v592_v53, %v539_v52 }
  0x10   :  { %v596_v57 = vld [vmem:[%s874_s0 + $0x74] sm:$0xf0]  ;;  %v595_v58 = vld [vmem:[%s874_s0 + $0x74] sm:$0xf]  ;;  %v561_v59 = vld [vmem:[%s874_s0 + $0x78] sm:$0xf0]  ;;  %v544_v61 = vor.u32 %v591_v54, %v541_v55 }
  0x11   :  { %v560_v62 = vor.u32 %v596_v57, %v559_v56  ;;  %v564_v63 = vor.u32 %v595_v58, %v561_v59 }
  0x12   :  { %170 = vmatpush.bf16.msra.mxu0 %v675_v8  ;;  %233 = vmatpush.bf16.msra.mxu2 %v675_v8 }
  0x13   :  { %189 = vmatpush.bf16.msra.mxu1 %v680_v9  ;;  %252 = vmatpush.bf16.msra.mxu3 %v680_v9 }
  0x16   :  { %171 = vmatpush.bf16.msra.mxu0 %v689_v10  ;;  %234 = vmatpush.bf16.msra.mxu2 %v689_v10 }
  0x17   :  { %190 = vmatpush.bf16.msra.mxu1 %v694_v11  ;;  %253 = vmatpush.bf16.msra.mxu3 %v694_v11 }
  0x1a   :  { %172 = vmatpush.bf16.msra.mxu0 %v703_v12  ;;  %235 = vmatpush.bf16.msra.mxu2 %v703_v12 }
  0x1b   :  { %191 = vmatpush.bf16.msra.mxu1 %v708_v13  ;;  %254 = vmatpush.bf16.msra.mxu3 %v708_v13 }
  0x1e   :  { %173 = vmatpush.bf16.msra.mxu0 %v715_v14  ;;  %236 = vmatpush.bf16.msra.mxu2 %v715_v14 }
  0x1f   :  { %192 = vmatpush.bf16.msra.mxu1 %v720_v15  ;;  %255 = vmatpush.bf16.msra.mxu3 %v720_v15 }
  0x21   :  { %174 = vmatmul.bf16.vlgmr.msra.gmra.mxu0 %v428_v24  ;;  %237 = vmatmul.bf16.vlgmr.msra.gmra.mxu2 %v512_v26  ;;  %v597_v26 = vld [vmem:[%s875_s2] ss:$0 sm:$0xff] }
  0x22   :  { %363 = vmatpush.bf16.msrb.mxu2 %v621_v0  ;;  %193 = vmatmul.bf16.vlgmr.msra.gmra.mxu1 %v432_v25 }
  0x23   :  { %382 = vmatpush.bf16.msrb.mxu3 %v626_v1  ;;  %296 = vmatpush.bf16.msrb.mxu0 %v621_v0 }
  0x24   :  { %256 = vmatmul.bf16.vlgmr.msra.gmra.mxu3 %v516_v27  ;;  %315 = vmatpush.bf16.msrb.mxu1 %v626_v1 }
  0x26   :  { %364 = vmatpush.bf16.msrb.mxu2 %v633_v2 }
  0x27   :  { %383 = vmatpush.bf16.msrb.mxu3 %v638_v3  ;;  %297 = vmatpush.bf16.msrb.mxu0 %v633_v2 }
  0x28   :  { %316 = vmatpush.bf16.msrb.mxu1 %v638_v3 }
  0x2a   :  { %365 = vmatpush.bf16.msrb.mxu2 %v647_v4 }
  0x2b   :  { %384 = vmatpush.bf16.msrb.mxu3 %v652_v5  ;;  %298 = vmatpush.bf16.msrb.mxu0 %v647_v4 }
  0x2c   :  { %317 = vmatpush.bf16.msrb.mxu1 %v652_v5 }
  0x2e   :  { %366 = vmatpush.bf16.msrb.mxu2 %v661_v6 }
  0x2f   :  { %385 = vmatpush.bf16.msrb.mxu3 %v666_v7  ;;  %299 = vmatpush.bf16.msrb.mxu0 %v661_v6 }
  0x30   :  { %318 = vmatpush.bf16.msrb.mxu1 %v666_v7 }
  0x31   :  { %179 = vmatmul.bf16.gmra.mxu0 %v436_v36  ;;  %242 = vmatmul.bf16.gmra.mxu2 %v520_v38 }
  0x32   :  { %367 = vmatpush.bf16.msrb.mxu2 %v675_v8  ;;  %198 = vmatmul.bf16.gmra.mxu1 %v440_v37 }
  0x33   :  { %386 = vmatpush.bf16.msrb.mxu3 %v680_v9  ;;  %300 = vmatpush.bf16.msrb.mxu0 %v675_v8 }
  0x34   :  { %261 = vmatmul.bf16.gmra.mxu3 %v524_v39  ;;  %319 = vmatpush.bf16.msrb.mxu1 %v680_v9 }
  0x36   :  { %368 = vmatpush.bf16.msrb.mxu2 %v689_v10 }
  0x37   :  { %387 = vmatpush.bf16.msrb.mxu3 %v694_v11  ;;  %301 = vmatpush.bf16.msrb.mxu0 %v689_v10 }
  0x38   :  { %320 = vmatpush.bf16.msrb.mxu1 %v694_v11 }
  0x3a   :  { %369 = vmatpush.bf16.msrb.mxu2 %v703_v12 }
  0x3b   :  { %388 = vmatpush.bf16.msrb.mxu3 %v708_v13  ;;  %302 = vmatpush.bf16.msrb.mxu0 %v703_v12 }
  0x3c   :  { %321 = vmatpush.bf16.msrb.mxu1 %v708_v13 }
  0x3e   :  { %370 = vmatpush.bf16.msrb.mxu2 %v715_v14 }
  0x3f   :  { %389 = vmatpush.bf16.msrb.mxu3 %v720_v15  ;;  %303 = vmatpush.bf16.msrb.mxu0 %v715_v14 }
  0x40   :  { %322 = vmatpush.bf16.msrb.mxu1 %v720_v15 }
  0x41   :  { %371 = vmatmul.bf16.vlgmr.msrb.gmra.mxu2 %v552_v50 }
  0x42   :  { %304 = vmatmul.bf16.vlgmr.msrb.gmra.mxu0 %v532_v48 }
  0x43   :  { %323 = vmatmul.bf16.vlgmr.msrb.gmra.mxu1 %v536_v49 }
  0x44   :  { %390 = vmatmul.bf16.vlgmr.msrb.gmra.mxu3 %v556_v51 }
  0x51   :  { %376 = vmatmul.bf16.gmra.mxu2 %v560_v62 }
  0x52   :  { %309 = vmatmul.bf16.gmra.mxu0 %v540_v60 }
  0x53   :  { %328 = vmatmul.bf16.gmra.mxu1 %v544_v61 }
  0x54   :  { %395 = vmatmul.bf16.gmra.mxu3 %v564_v63 }
  0x9e   :  { %v175_v0 = vpop.f32.mrf.mxu0 }
  0x9f   :  { %v194_v1 = vpop.f32.mrf.mxu1 }
  0xa0   :  { %v195_v19 = vadd.f32 %v194_v1, %v175_v0 }
  0xa4   :  { %v238_v2 = vpop.f32.mrf.mxu2 }
  0xa6   :  { %v177_v4 = vpop.f32.mrf.mxu0 }
  0xa7   :  { %v257_v3 = vpop.f32.mrf.mxu3  ;;  %v196_v5 = vpop.f32.mrf.mxu1 }
  0xa8   :  { %v258_v18 = vadd.f32 %v257_v3, %v238_v2  ;;  %v197_v31 = vadd.f32 %v196_v5, %v177_v4 }
  0xaa   :  { %v267_v21 = vmax.f32 %v195_v19, %v258_v18 }
  0xac   :  { %v240_v6 = vpop.f32.mrf.mxu2 }
  0xae   :  { %v180_v8 = vpop.f32.mrf.mxu0 }
  0xaf   :  { %v259_v7 = vpop.f32.mrf.mxu3  ;;  %v199_v9 = vpop.f32.mrf.mxu1 }
  0xb0   :  { %v260_v29 = vadd.f32 %v259_v7, %v240_v6  ;;  %v200_v44 = vadd.f32 %v199_v9, %v180_v8 }
  0xb2   :  { %v268_v34 = vmax.f32 %v197_v31, %v260_v29 }
  0xb4   :  { %v243_v10 = vpop.f32.mrf.mxu2 }
  0xb6   :  { %v182_v12 = vpop.f32.mrf.mxu0 }
  0xb7   :  { %v262_v11 = vpop.f32.mrf.mxu3  ;;  %v201_v13 = vpop.f32.mrf.mxu1 }
  0xb8   :  { %v263_v42 = vadd.f32 %v262_v11, %v243_v10  ;;  %v202_v57 = vadd.f32 %v201_v13, %v182_v12 }
  0xba   :  { %v269_v47 = vmax.f32 %v200_v44, %v263_v42 }
  0xbc   :  { %v245_v14 = vpop.f32.mrf.mxu2 }
  0xbf   :  { %v264_v15 = vpop.f32.mrf.mxu3  ;;  %v305_v16 = vpop.f32.mrf.mxu0 }
  0xc0   :  { %v324_v17 = vpop.f32.mrf.mxu1  ;;  %v265_v55 = vadd.f32 %v264_v15, %v245_v14 }
  0xc1   :  { %v325_v20 = vadd.f32 %v324_v17, %v305_v16 }
  0xc2   :  { %v270_v60 = vmax.f32 %v202_v57, %v265_v55 }
  0xc3   :  { %v334_v24 = vmax.f32 %v267_v21, %v325_v20 }
  0xc4   :  { %v372_v22 = vpop.f32.mrf.mxu2 }
  0xc7   :  { %v391_v23 = vpop.f32.mrf.mxu3  ;;  %v307_v27 = vpop.f32.mrf.mxu0 }
  0xc8   :  { %v392_v25 = vadd.f32 %v391_v23, %v372_v22  ;;  %v326_v28 = vpop.f32.mrf.mxu1 }
  0xc9   :  { %v327_v33 = vadd.f32 %v326_v28, %v307_v27 }
  0xca   :  { %v401_v30 = vmax.f32 %v334_v24, %v392_v25 }
  0xcb   :  { %v335_v38 = vmax.f32 %v268_v34, %v327_v33 }
  0xcc   :  { %v409_v32 = vadd.f32 %v597_v26, %v401_v30  ;;  %v374_v36 = vpop.f32.mrf.mxu2 }
  0xce   :  { %v413_v35 = vmax.f32 %v409_v32, 0.0 }
  0xcf   :  { %v393_v37 = vpop.f32.mrf.mxu3  ;;  %v310_v40 = vpop.f32.mrf.mxu0 }
  0xd0   :  { %417 = vst [vmem:[%s876_s3] sm:$0xff] %v413_v35  ;;  %v394_v39 = vadd.f32 %v393_v37, %v374_v36  ;;  %v329_v41 = vpop.f32.mrf.mxu1 }
  0xd1   :  { %v330_v46 = vadd.f32 %v329_v41, %v310_v40 }
  0xd2   :  { %v402_v43 = vmax.f32 %v335_v38, %v394_v39 }
  0xd3   :  { %v336_v51 = vmax.f32 %v269_v47, %v330_v46 }
  0xd4   :  { %v410_v45 = vadd.f32 %v597_v26, %v402_v43  ;;  %v377_v49 = vpop.f32.mrf.mxu2 }
  0xd6   :  { %v414_v48 = vmax.f32 %v410_v45, 0.0 }
  0xd7   :  { %v396_v50 = vpop.f32.mrf.mxu3  ;;  %v312_v53 = vpop.f32.mrf.mxu0 }
  0xd8   :  { %418 = vst [vmem:[%s876_s3 + $0x8] sm:$0xff] %v414_v48  ;;  %v397_v52 = vadd.f32 %v396_v50, %v377_v49  ;;  %v331_v54 = vpop.f32.mrf.mxu1 }
  0xd9   :  { %v332_v59 = vadd.f32 %v331_v54, %v312_v53 }
  0xda   :  { %v403_v56 = vmax.f32 %v336_v51, %v397_v52 }
  0xdb   :  { %v337_v0 = vmax.f32 %v270_v60, %v332_v59 }
  0xdc   :  { %v411_v58 = vadd.f32 %v597_v26, %v403_v56  ;;  %v379_v62 = vpop.f32.mrf.mxu2 }
  0xde   :  { %v415_v61 = vmax.f32 %v411_v58, 0.0 }
  0xdf   :  { %v398_v63 = vpop.f32.mrf.mxu3 }
  0xe0   :  { %419 = vst [vmem:[%s876_s3 + $0x10] sm:$0xff] %v415_v61  ;;  %v399_v1 = vadd.f32 %v398_v63, %v379_v62 }
  0xe2   :  { %v404_v2 = vmax.f32 %v337_v0, %v399_v1 }
  0xe4   :  { %v412_v3 = vadd.f32 %v597_v26, %v404_v2 }
  0xe6   :  { %v416_v4 = vmax.f32 %v412_v3, 0.0 }
  0xe8   :  { %420 = vst [vmem:[%s876_s3 + $0x18] sm:$0xff] %v416_v4 }

// kernel: mynet_forward.5
= control target key start
LH: loop header
LB: loop body
LE: loop exit
PB: predicated region body
PF: predicated region fallthrough
CT: control target
= control target key end

     0   :  { %s592_s0 = inlined_call_operand.vmem [shape: bf16[2,320], index: 0, kind: input, shape index: {}]   ;;  %s593_s1 = inlined_call_operand.vmem [shape: bf16[320,64], index: 1, kind: input, shape index: {}]   ;;  %s594_s2 = inlined_call_operand.vmem [shape: f32[1,64], index: 2, kind: input, shape index: {}]   ;;  %s595_s3 = inlined_call_operand.vmem [shape: bf16[64,128], index: 3, kind: input, shape index: {}]   ;;  %s596_s4 = inlined_call_operand.vmem [shape: f32[1,128], index: 4, kind: input, shape index: {}]   ;;  %s597_s5 = inlined_call_operand.hbm [shape: f32[2,128], index: 5, kind: output, shape index: {}]  }
   0x1   :  { %v425_v0 = vld [vmem:[%s593_s1 + $0x38] sm:$0xff]  ;;  %v424_v3 = vld [vmem:[%s593_s1 + $0x30] sm:$0xff]  ;;  %v22_v6 = vld [vmem:[%s592_s0] sm:$0x7] }
   0x2   :  { %v433_v1 = vld [vmem:[%s593_s1 + $0x78] sm:$0xff]  ;;  %197 = vmatpush.bf16.msra.mxu0 %v425_v0  ;;  %v432_v4 = vld [vmem:[%s593_s1 + $0x70] sm:$0xff]  ;;  %v423_v7 = vld [vmem:[%s593_s1 + $0x28] sm:$0xff]  ;;  %68 = vst [vmem:[#allocation1] ss:$9 sm:$0xff] %v22_v6 }
   0x3   :  { %v437_v2 = vld [vmem:[%s593_s1 + $0x98] sm:$0xff]  ;;  %210 = vmatpush.bf16.msra.mxu1 %v433_v1  ;;  %v436_v5 = vld [vmem:[%s593_s1 + $0x90] sm:$0xff]  ;;  %v431_v8 = vld [vmem:[%s593_s1 + $0x68] sm:$0xff] }
   0x4   :  { %227 = vmatpush.bf16.msra.mxu2 %v437_v2  ;;  %v435_v9 = vld [vmem:[%s593_s1 + $0x88] sm:$0xff] }
   0x6   :  { %198 = vmatpush.bf16.msra.mxu0 %v424_v3 }
   0x7   :  { %211 = vmatpush.bf16.msra.mxu1 %v432_v4 }
   0x8   :  { %228 = vmatpush.bf16.msra.mxu2 %v436_v5 }
   0x9   :  { %10 = vsyncpa [#allocation3], 0  ;;  %v422_v10 = vld [vmem:[%s593_s1 + $0x20] sm:$0xff]  ;;  %v421_v13 = vld [vmem:[%s593_s1 + $0x18] sm:$0xff]  ;;  %vm194_vm0 = vcmask 523264   ;;  %vm290_vm1 = vcmask 1041408  }
   0xa   :  { %199 = vmatpush.bf16.msra.mxu0 %v423_v7  ;;  %v430_v11 = vld [vmem:[%s593_s1 + $0x60] sm:$0xff]  ;;  %v429_v14 = vld [vmem:[%s593_s1 + $0x58] sm:$0xff]  ;;  %v420_v16 = vld [vmem:[%s593_s1 + $0x10] sm:$0xff]  ;;  %s311_s20 = sshll.u32 %s597_s5, 4  ;;  %s312_s20 = int_to_ptr.hbm [resolvable:$true] %s311_s20 }
   0xb   :  { %212 = vmatpush.bf16.msra.mxu1 %v431_v8  ;;  %v434_v12 = vld [vmem:[%s593_s1 + $0x80] sm:$0xff]  ;;  %v71_v15 = vld [vmem:[#allocation1 + $0x12] sm:$0xff]  ;;  %v419_v18 = vld [vmem:[%s593_s1 + $0x8] sm:$0xff] }
   0xc   :  { %229 = vmatpush.bf16.msra.mxu2 %v435_v9  ;;  %v428_v17 = vld [vmem:[%s593_s1 + $0x50] sm:$0xff]  ;;  %v427_v19 = vld [vmem:[%s593_s1 + $0x48] sm:$0xff]  ;;  %v418_v20 = vld [vmem:[%s593_s1] sm:$0xff] }
   0xd   :  { %v426_v21 = vld [vmem:[%s593_s1 + $0x40] sm:$0xff]  ;;  %v70_v23 = vld [vmem:[#allocation1 + $0x9] sm:$0xff]  ;;  %v441_v24 = vld [vmem:[%s595_s3 + $0x18] sm:$0xff] }
   0xe   :  { %200 = vmatpush.bf16.msra.mxu0 %v422_v10  ;;  %v69_v22 = vld [vmem:[#allocation1] sm:$0xff]  ;;  %281 = vmatpush.bf16.msra.mxu3 %v441_v24  ;;  %v440_v25 = vld [vmem:[%s595_s3 + $0x10] sm:$0xff]  ;;  %v439_v26 = vld [vmem:[%s595_s3 + $0x8] sm:$0xff] }
   0xf   :  { %213 = vmatpush.bf16.msra.mxu1 %v430_v11  ;;  %v438_v27 = vld [vmem:[%s595_s3] sm:$0xff] }
  0x10   :  { %230 = vmatpush.bf16.msra.mxu2 %v434_v12  ;;  %v443_v29 = vld [vmem:[%s594_s2] ss:$0 sm:$0xff]  ;;  %s475_s2 = smov [#allocation2]  }
  0x11   :  { %v444_v40 = vld [vmem:[%s596_s4] ss:$0 sm:$0xff]  ;;  %s309_s18 = sshll.u32 %s475_s2, 4  ;;  %s310_s18 = int_to_ptr.vmem [resolvable:$true] %s309_s18 }
  0x12   :  { %201 = vmatpush.bf16.msra.mxu0 %v421_v13  ;;  %282 = vmatpush.bf16.msra.mxu3 %v440_v25 }
  0x13   :  { %214 = vmatpush.bf16.msra.mxu1 %v429_v14  ;;  %400 = vmatmul.msk.bf16.vlgmr.msra.gmra.mxu2 %vm194_vm0, %v71_v15 }
  0x16   :  { %202 = vmatpush.bf16.msra.mxu0 %v420_v16  ;;  %283 = vmatpush.bf16.msra.mxu3 %v439_v26 }
  0x17   :  { %215 = vmatpush.bf16.msra.mxu1 %v428_v17 }
  0x1a   :  { %203 = vmatpush.bf16.msra.mxu0 %v419_v18  ;;  %284 = vmatpush.bf16.msra.mxu3 %v438_v27 }
  0x1b   :  { %216 = vmatpush.bf16.msra.mxu1 %v427_v19 }
  0x1e   :  { %204 = vmatpush.bf16.msra.mxu0 %v418_v20 }
  0x1f   :  { %217 = vmatpush.bf16.msra.mxu1 %v426_v21 }
  0x21   :  { %205 = vmatmul.bf16.vlgmr.msra.gmra.mxu0 %v69_v22 }
  0x22   :  { %218 = vmatmul.bf16.vlgmr.msra.gmra.mxu1 %v70_v23 }
  0x96   :  { %v232_v28 = vpop.f32.mrf.mxu2 }
  0x9e   :  { %v206_v30 = vpop.f32.mrf.mxu0  ;;  %v234_v33 = vpop.f32.mrf.mxu2 }
  0x9f   :  { %v219_v31 = vpop.f32.mrf.mxu1  ;;  %v207_v32 = vadd.f32 %v443_v29, %v206_v30 }
  0xa1   :  { %v220_v34 = vadd.f32 %v219_v31, %v207_v32 }
  0xa3   :  { %v233_v35 = vadd.f32 %v232_v28, %v220_v34 }
  0xa5   :  { %v236_v36 = vmax.f32 %v233_v35, 0.0 }
  0xa6   :  { %v208_v37 = vpop.f32.mrf.mxu0 }
  0xa7   :  { %v221_v38 = vpop.f32.mrf.mxu1  ;;  %v237_v39 = vpack.c.bf16 %v236_v36, %v236_v36 }
  0xa9   :  { %417 = vmatmul.msk.bf16.vlgmr.msra.gmra.mxu3 %vm194_vm0, %v237_v39 }
 0x12c   :  { %v286_v41 = vpop.f32.mrf.mxu3 }
 0x12d   :  { %v287_v42 = vadd.f32 %v444_v40, %v286_v41 }
 0x12f   :  { %v291_v43 = vsel %vm290_vm1, %v287_v42, -inf }
 0x130   :  { %292 = vmax.xlane.f32.xlu0 %v291_v43 }
 0x134   :  { %v288_v44 = vpop.f32.mrf.mxu3 }
 0x1a3   :  { %v293_v45 = vpop.xlane.xlu0 %292 }
 0x1a4   :  { %v294_v46 = vsub.f32 %v287_v42, %v293_v45 }
 0x1a6   :  { %v295_v47 = vmul.f32 1.442695, %v294_v46 }
 0x1a8   :  { %445 = vpow2.f32 %v295_v47 }
 0x1ae   :  { %v446_v48 = vpop.eup %445 }
 0x1af   :  { %v297_v49 = vsel %vm290_vm1, %v446_v48, 0.0 }
 0x1b0   :  { %298 = vadd.xlane.f32.xlu0 %v297_v49 }
 0x223   :  { %v299_v50 = vpop.xlane.xlu0 %298 }
 0x224   :  { %447 = vlog2.f32 %v299_v50 }
 0x22a   :  { %v448_v51 = vpop.eup %447 }
 0x22b   :  { %v301_v52 = vmul.f32 0.6931472, %v448_v51 }
 0x22d   :  { %v302_v53 = vsub.f32 %v294_v46, %v301_v52 }
 0x22f   :  { %303 = vst [vmem:[#allocation2] sm:$0x3] %v302_v53 }
 0x230   :  { %314 = dma.vmem_to_hbm [thread:$0]  %s310_s18, 32, %s312_s20, [#allocation3]  }
 0x231   :  { %473 = dma.done.wait [#allocation3], 32  }
 0x232   :  { %474 = vsyncadd [#allocation3], 4294967264 }
 0x233   :  { %319 = vsyncpa [#allocation3], 1 }

</bundles_post_ra>
